<compile_context>
chip_gen: v6e
topology: v6e:2x2x1
jax: 0.10.0
libtpu: 0.0.40
codegen_flags: <defaults>
</compile_context>

<pallas_src>
import functools

import jax
import jax.numpy as jnp
from jax import lax
from jax.experimental import pallas as pl
from jax.experimental.pallas import tpu as pltpu


def lstm_ner_kernel(x_ref, wih_ref, whh_ref, b_ref, wfc_ref, bfc_ref,
                    out_ref, gx_sc, hs_sc, *, T, Bph, H):
    """Fused LSTM + Linear for one batch shard.

    x_ref   : (T*Bph, E)   time-major, batch-padded embedded tokens (row = t*Bph + b)
    wih_ref : (E, 4H)      input->gates weights, gate order [i,f,o,g]
    whh_ref : (H, 4H)      hidden->gates weights, gate order [i,f,o,g]
    b_ref   : (1, 4H)      b_ih + b_hh, gate order [i,f,o,g] (f32)
    wfc_ref : (H, Cp)      fc weight transposed, lane-padded
    bfc_ref : (1, Cp)      fc bias, lane-padded (f32)
    out_ref : (T*Bph, Cp)  logits (row = t*Bph + b)
    gx_sc   : (T*Bph, 4H)  precomputed input projection (VMEM scratch, f32)
    hs_sc   : (T*Bph, H)   all hidden states, lane-dense (VMEM scratch, f32)
    """
    # ---- Phase 1: batched input projection (off the serial path) ----
    gx_sc[...] = (jnp.dot(x_ref[...], wih_ref[...],
                          preferred_element_type=jnp.float32)
                  + b_ref[...])                                   # (T*Bph, 4H)

    # ---- Phase 2: serial recurrence; h / c carried in vregs ----
    def step(t, carry):
        h, c = carry
        row = pl.multiple_of(t * Bph, Bph)                        # sublane-aligned
        gates = gx_sc[pl.ds(row, Bph), :] + jnp.dot(
            h.astype(whh_ref.dtype), whh_ref[...],
            preferred_element_type=jnp.float32)                   # (Bph, 4H)

        # Gate order [i | f | o | g]; sigmoid via tanh: 1 EUP op for the (Bph,3H) slab.
        sg = 0.5 * (1.0 + jnp.tanh(0.5 * gates[:, :3 * H]))
        i_g = sg[:, 0:H]
        f_g = sg[:, H:2 * H]
        o_g = sg[:, 2 * H:3 * H]
        g_g = jnp.tanh(gates[:, 3 * H:4 * H])

        c_new = f_g * c + i_g * g_g
        h_new = o_g * jnp.tanh(c_new)
        hs_sc[pl.ds(row, Bph), :] = h_new                         # lane-dense (H) store
        return (h_new, c_new)

    h0 = jnp.zeros((Bph, H), jnp.float32)
    c0 = jnp.zeros((Bph, H), jnp.float32)
    lax.fori_loop(0, T, step, (h0, c0), unroll=True if T <= 16 else 4)

    # ---- Phase 3: batched, lane-dense output projection (one matmul, one store) ----
    out_ref[...] = (jnp.dot(hs_sc[...].astype(wfc_ref.dtype), wfc_ref[...],
                            preferred_element_type=jnp.float32)
                    + bfc_ref[...]).astype(out_ref.dtype)


def lstm_ner_forward(tokens, params, *, num_batch_shards=1,
                     matmul_dtype=jnp.float32):
    """tokens: int32 (B, T). Returns logits (B, T, tagset_size), float32.

    num_batch_shards: set 2 on v7x (2 TensorCores) when the batch is large enough;
                      each shard runs the full recurrence on its own batch slice.
    matmul_dtype:     jnp.bfloat16 on v6e/v7x for native-MXU matmuls (f32 accumulate,
                      f32 gate math); default f32 preserves the 1e-4 reference check.
    """
    emb_w = params["embedding"]          # (V, E)
    w_ih = params["w_ih"]                # (4H, E)  (PyTorch layout, gate order i,f,g,o)
    w_hh = params["w_hh"]                # (4H, H)
    b_ih = params["b_ih"]                # (4H,)
    b_hh = params["b_hh"]                # (4H,)
    w_fc = params["w_fc"]                # (C, H)
    b_fc = params["b_fc"]                # (C,)

    B, T = tokens.shape
    E = emb_w.shape[1]
    H = w_hh.shape[1]
    C = w_fc.shape[0]
    S = int(num_batch_shards)

    # Sublane alignment: 8 f32 rows per vreg; 16 for bf16 packing.
    row_align = 16 if jnp.dtype(matmul_dtype) == jnp.dtype(jnp.bfloat16) else 8
    b_per_shard = -(-B // S)
    Bph = ((b_per_shard + row_align - 1) // row_align) * row_align
    Bp = S * Bph
    TBp = T * Bph
    Cp = ((C + 127) // 128) * 128        # lane-dense FC output width

    # Embedding gather, time-major directly (no post-gather transpose). Padded batch
    # rows are zeros and independent of real rows; they are discarded at the end.
    x_tm = jnp.take(emb_w, tokens.T, axis=0).astype(jnp.float32)   # (T, B, E)
    if Bp != B:
        x_tm = jnp.pad(x_tm, ((0, 0), (0, Bp - B), (0, 0)))
    # Shard-major flatten: row = ((s*T) + t)*Bph + local_b
    x2d = (x_tm.reshape(T, S, Bph, E)
               .transpose(1, 0, 2, 3)
               .reshape(S * TBp, E)
               .astype(matmul_dtype))

    # Permute PyTorch gate order [i,f,g,o] -> [i,f,o,g] so sigmoid covers one contiguous
    # (Bph, 3H) slab and tanh one (Bph, H) slab inside the kernel.
    perm = jnp.concatenate([jnp.arange(0, 2 * H),
                            jnp.arange(3 * H, 4 * H),
                            jnp.arange(2 * H, 3 * H)])
    wih_t = jnp.transpose(w_ih[perm]).astype(matmul_dtype)         # (E, 4H)
    whh_t = jnp.transpose(w_hh[perm]).astype(matmul_dtype)         # (H, 4H)
    bg = (b_ih + b_hh)[perm].reshape(1, 4 * H).astype(jnp.float32)

    wfc_t = jnp.zeros((H, Cp), matmul_dtype).at[:, :C].set(
        jnp.transpose(w_fc).astype(matmul_dtype))                  # (H, Cp)
    bfc = jnp.zeros((1, Cp), jnp.float32).at[:, :C].set(b_fc.astype(jnp.float32))

    # Explicit VMEM budget: above the v5e scoped default, capped at v7x's 64 MiB physical.
    isz = jnp.dtype(matmul_dtype).itemsize
    est = (TBp * E * isz + E * 4 * H * isz + H * 4 * H * isz + 4 * H * 4
           + H * Cp * isz + Cp * 4 + TBp * Cp * 4          # pipelined in/out blocks
           + TBp * 4 * H * 4 + TBp * H * 4)                # gx_sc + hs_sc scratch
    vmem_limit = int(max(32 << 20, min(2 * est + (8 << 20), 64 << 20)))

    kernel = functools.partial(lstm_ner_kernel, T=T, Bph=Bph, H=H)

    out2d = pl.pallas_call(
        kernel,
        out_shape=jax.ShapeDtypeStruct((S * TBp, Cp), jnp.float32),
        grid_spec=pltpu.PrefetchScalarGridSpec(
            num_scalar_prefetch=0,
            grid=(S,),                                   # batch shards (1, or 2 on v7x)
            in_specs=[
                pl.BlockSpec((TBp, E), lambda s: (s, 0)),
                pl.BlockSpec((E, 4 * H), lambda s: (0, 0)),
                pl.BlockSpec((H, 4 * H), lambda s: (0, 0)),
                pl.BlockSpec((1, 4 * H), lambda s: (0, 0)),
                pl.BlockSpec((H, Cp), lambda s: (0, 0)),
                pl.BlockSpec((1, Cp), lambda s: (0, 0)),
            ],
            out_specs=pl.BlockSpec((TBp, Cp), lambda s: (s, 0)),
            scratch_shapes=[
                pltpu.VMEM((TBp, 4 * H), jnp.float32),   # gx: input projection
                pltpu.VMEM((TBp, H), jnp.float32),       # hs: all hidden states
            ],
        ),
        compiler_params=pltpu.CompilerParams(
            dimension_semantics=("parallel",),
            vmem_limit_bytes=vmem_limit,
        ),
    )(x2d, wih_t, whh_t, bg, wfc_t, bfc)

    out = (out2d.reshape(S, T, Bph, Cp)
                .transpose(1, 0, 2, 3)
                .reshape(T, Bp, Cp)[:, :B, :C])                    # (T, B, C)
    return jnp.transpose(out, (1, 0, 2))                           # (B, T, C)


def lstm_ner_reference(tokens, params):
    """Pure-JAX reference mirroring torch semantics (for sanity check)."""
    emb = jnp.take(params["embedding"], tokens, axis=0).astype(jnp.float32)  # (B,T,E)
    H = params["w_hh"].shape[1]
    w_ih_t = params["w_ih"].T
    w_hh_t = params["w_hh"].T
    b = params["b_ih"] + params["b_hh"]

    def step(carry, x_t):
        h, c = carry
        gates = x_t @ w_ih_t + h @ w_hh_t + b
        i = jax.nn.sigmoid(gates[:, 0 * H:1 * H])
        f = jax.nn.sigmoid(gates[:, 1 * H:2 * H])
        g = jnp.tanh(gates[:, 2 * H:3 * H])
        o = jax.nn.sigmoid(gates[:, 3 * H:4 * H])
        c = f * c + i * g
        h = o * jnp.tanh(c)
        return (h, c), h

    B = tokens.shape[0]
    h0 = jnp.zeros((B, H), jnp.float32)
    c0 = jnp.zeros((B, H), jnp.float32)
    _, hs = jax.lax.scan(step, (h0, c0), jnp.transpose(emb, (1, 0, 2)))  # (T,B,H)
    out = hs @ params["w_fc"].T + params["b_fc"]
    return jnp.transpose(out, (1, 0, 2))


def init_params(key, vocab_size, tagset_size, embedding_dim=64, hidden_dim=128):
    ks = jax.random.split(key, 7)
    scale = 0.1
    emb = scale * jax.random.normal(ks[0], (vocab_size, embedding_dim), jnp.float32)
    emb = emb.at[0].set(0.0)  # padding_idx=0
    return {
        "embedding": emb,
        "w_ih": scale * jax.random.normal(ks[1], (4 * hidden_dim, embedding_dim), jnp.float32),
        "w_hh": scale * jax.random.normal(ks[2], (4 * hidden_dim, hidden_dim), jnp.float32),
        "b_ih": scale * jax.random.normal(ks[3], (4 * hidden_dim,), jnp.float32),
        "b_hh": scale * jax.random.normal(ks[4], (4 * hidden_dim,), jnp.float32),
        "w_fc": scale * jax.random.normal(ks[5], (tagset_size, hidden_dim), jnp.float32),
        "b_fc": scale * jax.random.normal(ks[6], (tagset_size,), jnp.float32),
    }


if __name__ == "__main__":
    key = jax.random.PRNGKey(0)
    vocab_size, tagset_size = 50, 8
    B, T = 2, 8

    pkey, tkey = jax.random.split(key)
    params = init_params(pkey, vocab_size, tagset_size)
    tokens = jax.random.randint(tkey, (B, T), 0, vocab_size, dtype=jnp.int32)

    out = lstm_ner_forward(tokens, params)
    out = jax.block_until_ready(out)

    ref = lstm_ner_reference(tokens, params)
    assert out.shape == (B, T, tagset_size)
    assert jnp.allclose(out, ref, atol=1e-4, rtol=1e-4), "mismatch vs reference"

    print("KERNEL_OK")
</pallas_src>

<mosaic_0001>
module attributes {stable_mosaic.version = 11 : i64} {
  func.func @lstm_ner_kernel(%arg0: i32, %arg1: memref<64x64xf32, #tpu.memory_space<vmem>>, %arg2: memref<64x512xf32, #tpu.memory_space<vmem>>, %arg3: memref<128x512xf32, #tpu.memory_space<vmem>>, %arg4: memref<1x512xf32, #tpu.memory_space<vmem>>, %arg5: memref<128x128xf32, #tpu.memory_space<vmem>>, %arg6: memref<1x128xf32, #tpu.memory_space<vmem>>, %arg7: memref<64x128xf32, #tpu.memory_space<vmem>>, %arg8: memref<64x512xf32, #tpu.memory_space<vmem>>, %arg9: memref<64x128xf32, #tpu.memory_space<vmem>>) attributes {dimension_semantics = [#tpu.dimension_semantics<parallel>], iteration_bounds = array<i64: 1>, scalar_prefetch = 0 : i64, scratch_operands = 2 : i64, tpu.core_type = #tpu.core_type<tc>, window_params = [{transform_indices = @transform_0, window_bounds = array<i64: 64, 64>}, {pipeline_mode = #tpu.pipeline_mode<synchronous>, transform_indices = @transform_1, window_bounds = array<i64: 64, 512>}, {pipeline_mode = #tpu.pipeline_mode<synchronous>, transform_indices = @transform_2, window_bounds = array<i64: 128, 512>}, {pipeline_mode = #tpu.pipeline_mode<synchronous>, transform_indices = @transform_3, window_bounds = array<i64: 1, 512>}, {pipeline_mode = #tpu.pipeline_mode<synchronous>, transform_indices = @transform_4, window_bounds = array<i64: 128, 128>}, {pipeline_mode = #tpu.pipeline_mode<synchronous>, transform_indices = @transform_5, window_bounds = array<i64: 1, 128>}, {transform_indices = @transform_6, window_bounds = array<i64: 64, 128>}]} {
    %c0 = arith.constant 0 : index
    %c0_0 = arith.constant 0 : index
    %0 = vector.load %arg1[%c0, %c0_0] : memref<64x64xf32, #tpu.memory_space<vmem>>, vector<64x64xf32>
    %c0_1 = arith.constant 0 : index
    %c0_2 = arith.constant 0 : index
    %1 = vector.load %arg2[%c0_1, %c0_2] : memref<64x512xf32, #tpu.memory_space<vmem>>, vector<64x512xf32>
    %cst = arith.constant dense<0.000000e+00> : vector<64x512xf32>
    %2 = tpu.matmul %0, %1, %cst {dimension_numbers = #tpu.dot_dimension_numbers<[1], [0], [0], [1], [0, 0, 1, 1], [], []>} : vector<64x64xf32>, vector<64x512xf32>, vector<64x512xf32> -> vector<64x512xf32>
    %c0_3 = arith.constant 0 : index
    %c0_4 = arith.constant 0 : index
    %3 = vector.load %arg4[%c0_3, %c0_4] : memref<1x512xf32, #tpu.memory_space<vmem>>, vector<1x512xf32>
    %4 = vector.broadcast %3 : vector<1x512xf32> to vector<64x512xf32>
    %5 = arith.addf %2, %4 : vector<64x512xf32>
    %c0_5 = arith.constant 0 : index
    %c0_6 = arith.constant 0 : index
    %6 = vector.load %arg8[%c0_5, %c0_6] : memref<64x512xf32, #tpu.memory_space<vmem>>, vector<64x512xf32>
    tpu.vector_store %arg8[%c0_5, %c0_6], %5 {strides = array<i32>} : memref<64x512xf32, #tpu.memory_space<vmem>>, vector<64x512xf32>,
    %cst_7 = arith.constant 0.000000e+00 : f32
    %7 = vector.broadcast %cst_7 : f32 to vector<8x128xf32>
    %cst_8 = arith.constant 0.000000e+00 : f32
    %8 = vector.broadcast %cst_8 : f32 to vector<8x128xf32>
    %c0_i32 = arith.constant 0 : i32
    %c8_i32 = arith.constant 8 : i32
    %9 = arith.muli %c0_i32, %c8_i32 : i32
    %10 = tpu.assume_multiple %9, 8 : i32
    %11 = arith.index_cast %10 : i32 to index
    %c0_9 = arith.constant 0 : index
    %12 = vector.load %arg8[%11, %c0_9] : memref<64x512xf32, #tpu.memory_space<vmem>>, vector<8x512xf32>
    %c0_10 = arith.constant 0 : index
    %c0_11 = arith.constant 0 : index
    %13 = vector.load %arg3[%c0_10, %c0_11] : memref<128x512xf32, #tpu.memory_space<vmem>>, vector<128x512xf32>
    %cst_12 = arith.constant dense<0.000000e+00> : vector<8x512xf32>
    %14 = tpu.matmul %7, %13, %cst_12 {dimension_numbers = #tpu.dot_dimension_numbers<[1], [0], [0], [1], [0, 0, 1, 1], [], []>} : vector<8x128xf32>, vector<128x512xf32>, vector<8x512xf32> -> vector<8x512xf32>
    %15 = arith.addf %12, %14 : vector<8x512xf32>
    %16 = vector.extract_strided_slice %15 {offsets = [0, 0], sizes = [8, 384], strides = [1, 1]} : vector<8x512xf32> to vector<8x384xf32>
    %cst_13 = arith.constant 5.000000e-01 : f32
    %17 = vector.broadcast %cst_13 : f32 to vector<8x384xf32>
    %18 = arith.mulf %17, %16 : vector<8x384xf32>
    %19 = math.tanh %18 : vector<8x384xf32>
    %cst_14 = arith.constant 1.000000e+00 : f32
    %20 = vector.broadcast %cst_14 : f32 to vector<8x384xf32>
    %21 = arith.addf %20, %19 : vector<8x384xf32>
    %cst_15 = arith.constant 5.000000e-01 : f32
    %22 = vector.broadcast %cst_15 : f32 to vector<8x384xf32>
    %23 = arith.mulf %22, %21 : vector<8x384xf32>
    %24 = vector.extract_strided_slice %23 {offsets = [0, 0], sizes = [8, 128], strides = [1, 1]} : vector<8x384xf32> to vector<8x128xf32>
    %25 = vector.extract_strided_slice %23 {offsets = [0, 128], sizes = [8, 128], strides = [1, 1]} : vector<8x384xf32> to vector<8x128xf32>
    %26 = vector.extract_strided_slice %23 {offsets = [0, 256], sizes = [8, 128], strides = [1, 1]} : vector<8x384xf32> to vector<8x128xf32>
    %27 = vector.extract_strided_slice %15 {offsets = [0, 384], sizes = [8, 128], strides = [1, 1]} : vector<8x512xf32> to vector<8x128xf32>
    %28 = math.tanh %27 : vector<8x128xf32>
    %29 = arith.mulf %25, %8 : vector<8x128xf32>
    %30 = arith.mulf %24, %28 : vector<8x128xf32>
    %31 = arith.addf %29, %30 : vector<8x128xf32>
    %32 = math.tanh %31 : vector<8x128xf32>
    %33 = arith.mulf %26, %32 : vector<8x128xf32>
    %34 = arith.index_cast %10 : i32 to index
    %c0_16 = arith.constant 0 : index
    %35 = vector.load %arg9[%34, %c0_16] : memref<64x128xf32, #tpu.memory_space<vmem>>, vector<8x128xf32>
    tpu.vector_store %arg9[%34, %c0_16], %33 {strides = array<i32>} : memref<64x128xf32, #tpu.memory_space<vmem>>, vector<8x128xf32>,
    %c1_i32 = arith.constant 1 : i32
    %c8_i32_17 = arith.constant 8 : i32
    %36 = arith.muli %c1_i32, %c8_i32_17 : i32
    %37 = tpu.assume_multiple %36, 8 : i32
    %38 = arith.index_cast %37 : i32 to index
    %c0_18 = arith.constant 0 : index
    %39 = vector.load %arg8[%38, %c0_18] : memref<64x512xf32, #tpu.memory_space<vmem>>, vector<8x512xf32>
    %c0_19 = arith.constant 0 : index
    %c0_20 = arith.constant 0 : index
    %40 = vector.load %arg3[%c0_19, %c0_20] : memref<128x512xf32, #tpu.memory_space<vmem>>, vector<128x512xf32>
    %cst_21 = arith.constant dense<0.000000e+00> : vector<8x512xf32>
    %41 = tpu.matmul %33, %40, %cst_21 {dimension_numbers = #tpu.dot_dimension_numbers<[1], [0], [0], [1], [0, 0, 1, 1], [], []>} : vector<8x128xf32>, vector<128x512xf32>, vector<8x512xf32> -> vector<8x512xf32>
    %42 = arith.addf %39, %41 : vector<8x512xf32>
    %43 = vector.extract_strided_slice %42 {offsets = [0, 0], sizes = [8, 384], strides = [1, 1]} : vector<8x512xf32> to vector<8x384xf32>
    %cst_22 = arith.constant 5.000000e-01 : f32
    %44 = vector.broadcast %cst_22 : f32 to vector<8x384xf32>
    %45 = arith.mulf %44, %43 : vector<8x384xf32>
    %46 = math.tanh %45 : vector<8x384xf32>
    %cst_23 = arith.constant 1.000000e+00 : f32
    %47 = vector.broadcast %cst_23 : f32 to vector<8x384xf32>
    %48 = arith.addf %47, %46 : vector<8x384xf32>
    %cst_24 = arith.constant 5.000000e-01 : f32
    %49 = vector.broadcast %cst_24 : f32 to vector<8x384xf32>
    %50 = arith.mulf %49, %48 : vector<8x384xf32>
    %51 = vector.extract_strided_slice %50 {offsets = [0, 0], sizes = [8, 128], strides = [1, 1]} : vector<8x384xf32> to vector<8x128xf32>
    %52 = vector.extract_strided_slice %50 {offsets = [0, 128], sizes = [8, 128], strides = [1, 1]} : vector<8x384xf32> to vector<8x128xf32>
    %53 = vector.extract_strided_slice %50 {offsets = [0, 256], sizes = [8, 128], strides = [1, 1]} : vector<8x384xf32> to vector<8x128xf32>
    %54 = vector.extract_strided_slice %42 {offsets = [0, 384], sizes = [8, 128], strides = [1, 1]} : vector<8x512xf32> to vector<8x128xf32>
    %55 = math.tanh %54 : vector<8x128xf32>
    %56 = arith.mulf %52, %31 : vector<8x128xf32>
    %57 = arith.mulf %51, %55 : vector<8x128xf32>
    %58 = arith.addf %56, %57 : vector<8x128xf32>
    %59 = math.tanh %58 : vector<8x128xf32>
    %60 = arith.mulf %53, %59 : vector<8x128xf32>
    %61 = arith.index_cast %37 : i32 to index
    %c0_25 = arith.constant 0 : index
    %62 = vector.load %arg9[%61, %c0_25] : memref<64x128xf32, #tpu.memory_space<vmem>>, vector<8x128xf32>
    tpu.vector_store %arg9[%61, %c0_25], %60 {strides = array<i32>} : memref<64x128xf32, #tpu.memory_space<vmem>>, vector<8x128xf32>,
    %c2_i32 = arith.constant 2 : i32
    %c8_i32_26 = arith.constant 8 : i32
    %63 = arith.muli %c2_i32, %c8_i32_26 : i32
    %64 = tpu.assume_multiple %63, 8 : i32
    %65 = arith.index_cast %64 : i32 to index
    %c0_27 = arith.constant 0 : index
    %66 = vector.load %arg8[%65, %c0_27] : memref<64x512xf32, #tpu.memory_space<vmem>>, vector<8x512xf32>
    %c0_28 = arith.constant 0 : index
    %c0_29 = arith.constant 0 : index
    %67 = vector.load %arg3[%c0_28, %c0_29] : memref<128x512xf32, #tpu.memory_space<vmem>>, vector<128x512xf32>
    %cst_30 = arith.constant dense<0.000000e+00> : vector<8x512xf32>
    %68 = tpu.matmul %60, %67, %cst_30 {dimension_numbers = #tpu.dot_dimension_numbers<[1], [0], [0], [1], [0, 0, 1, 1], [], []>} : vector<8x128xf32>, vector<128x512xf32>, vector<8x512xf32> -> vector<8x512xf32>
    %69 = arith.addf %66, %68 : vector<8x512xf32>
    %70 = vector.extract_strided_slice %69 {offsets = [0, 0], sizes = [8, 384], strides = [1, 1]} : vector<8x512xf32> to vector<8x384xf32>
    %cst_31 = arith.constant 5.000000e-01 : f32
    %71 = vector.broadcast %cst_31 : f32 to vector<8x384xf32>
    %72 = arith.mulf %71, %70 : vector<8x384xf32>
    %73 = math.tanh %72 : vector<8x384xf32>
    %cst_32 = arith.constant 1.000000e+00 : f32
    %74 = vector.broadcast %cst_32 : f32 to vector<8x384xf32>
    %75 = arith.addf %74, %73 : vector<8x384xf32>
    %cst_33 = arith.constant 5.000000e-01 : f32
    %76 = vector.broadcast %cst_33 : f32 to vector<8x384xf32>
    %77 = arith.mulf %76, %75 : vector<8x384xf32>
    %78 = vector.extract_strided_slice %77 {offsets = [0, 0], sizes = [8, 128], strides = [1, 1]} : vector<8x384xf32> to vector<8x128xf32>
    %79 = vector.extract_strided_slice %77 {offsets = [0, 128], sizes = [8, 128], strides = [1, 1]} : vector<8x384xf32> to vector<8x128xf32>
    %80 = vector.extract_strided_slice %77 {offsets = [0, 256], sizes = [8, 128], strides = [1, 1]} : vector<8x384xf32> to vector<8x128xf32>
    %81 = vector.extract_strided_slice %69 {offsets = [0, 384], sizes = [8, 128], strides = [1, 1]} : vector<8x512xf32> to vector<8x128xf32>
    %82 = math.tanh %81 : vector<8x128xf32>
    %83 = arith.mulf %79, %58 : vector<8x128xf32>
    %84 = arith.mulf %78, %82 : vector<8x128xf32>
    %85 = arith.addf %83, %84 : vector<8x128xf32>
    %86 = math.tanh %85 : vector<8x128xf32>
    %87 = arith.mulf %80, %86 : vector<8x128xf32>
    %88 = arith.index_cast %64 : i32 to index
    %c0_34 = arith.constant 0 : index
    %89 = vector.load %arg9[%88, %c0_34] : memref<64x128xf32, #tpu.memory_space<vmem>>, vector<8x128xf32>
    tpu.vector_store %arg9[%88, %c0_34], %87 {strides = array<i32>} : memref<64x128xf32, #tpu.memory_space<vmem>>, vector<8x128xf32>,
    %c3_i32 = arith.constant 3 : i32
    %c8_i32_35 = arith.constant 8 : i32
    %90 = arith.muli %c3_i32, %c8_i32_35 : i32
    %91 = tpu.assume_multiple %90, 8 : i32
    %92 = arith.index_cast %91 : i32 to index
    %c0_36 = arith.constant 0 : index
    %93 = vector.load %arg8[%92, %c0_36] : memref<64x512xf32, #tpu.memory_space<vmem>>, vector<8x512xf32>
    %c0_37 = arith.constant 0 : index
    %c0_38 = arith.constant 0 : index
    %94 = vector.load %arg3[%c0_37, %c0_38] : memref<128x512xf32, #tpu.memory_space<vmem>>, vector<128x512xf32>
    %cst_39 = arith.constant dense<0.000000e+00> : vector<8x512xf32>
    %95 = tpu.matmul %87, %94, %cst_39 {dimension_numbers = #tpu.dot_dimension_numbers<[1], [0], [0], [1], [0, 0, 1, 1], [], []>} : vector<8x128xf32>, vector<128x512xf32>, vector<8x512xf32> -> vector<8x512xf32>
    %96 = arith.addf %93, %95 : vector<8x512xf32>
    %97 = vector.extract_strided_slice %96 {offsets = [0, 0], sizes = [8, 384], strides = [1, 1]} : vector<8x512xf32> to vector<8x384xf32>
    %cst_40 = arith.constant 5.000000e-01 : f32
    %98 = vector.broadcast %cst_40 : f32 to vector<8x384xf32>
    %99 = arith.mulf %98, %97 : vector<8x384xf32>
    %100 = math.tanh %99 : vector<8x384xf32>
    %cst_41 = arith.constant 1.000000e+00 : f32
    %101 = vector.broadcast %cst_41 : f32 to vector<8x384xf32>
    %102 = arith.addf %101, %100 : vector<8x384xf32>
    %cst_42 = arith.constant 5.000000e-01 : f32
    %103 = vector.broadcast %cst_42 : f32 to vector<8x384xf32>
    %104 = arith.mulf %103, %102 : vector<8x384xf32>
    %105 = vector.extract_strided_slice %104 {offsets = [0, 0], sizes = [8, 128], strides = [1, 1]} : vector<8x384xf32> to vector<8x128xf32>
    %106 = vector.extract_strided_slice %104 {offsets = [0, 128], sizes = [8, 128], strides = [1, 1]} : vector<8x384xf32> to vector<8x128xf32>
    %107 = vector.extract_strided_slice %104 {offsets = [0, 256], sizes = [8, 128], strides = [1, 1]} : vector<8x384xf32> to vector<8x128xf32>
    %108 = vector.extract_strided_slice %96 {offsets = [0, 384], sizes = [8, 128], strides = [1, 1]} : vector<8x512xf32> to vector<8x128xf32>
    %109 = math.tanh %108 : vector<8x128xf32>
    %110 = arith.mulf %106, %85 : vector<8x128xf32>
    %111 = arith.mulf %105, %109 : vector<8x128xf32>
    %112 = arith.addf %110, %111 : vector<8x128xf32>
    %113 = math.tanh %112 : vector<8x128xf32>
    %114 = arith.mulf %107, %113 : vector<8x128xf32>
    %115 = arith.index_cast %91 : i32 to index
    %c0_43 = arith.constant 0 : index
    %116 = vector.load %arg9[%115, %c0_43] : memref<64x128xf32, #tpu.memory_space<vmem>>, vector<8x128xf32>
    tpu.vector_store %arg9[%115, %c0_43], %114 {strides = array<i32>} : memref<64x128xf32, #tpu.memory_space<vmem>>, vector<8x128xf32>,
    %c4_i32 = arith.constant 4 : i32
    %c8_i32_44 = arith.constant 8 : i32
    %117 = arith.muli %c4_i32, %c8_i32_44 : i32
    %118 = tpu.assume_multiple %117, 8 : i32
    %119 = arith.index_cast %118 : i32 to index
    %c0_45 = arith.constant 0 : index
    %120 = vector.load %arg8[%119, %c0_45] : memref<64x512xf32, #tpu.memory_space<vmem>>, vector<8x512xf32>
    %c0_46 = arith.constant 0 : index
    %c0_47 = arith.constant 0 : index
    %121 = vector.load %arg3[%c0_46, %c0_47] : memref<128x512xf32, #tpu.memory_space<vmem>>, vector<128x512xf32>
    %cst_48 = arith.constant dense<0.000000e+00> : vector<8x512xf32>
    %122 = tpu.matmul %114, %121, %cst_48 {dimension_numbers = #tpu.dot_dimension_numbers<[1], [0], [0], [1], [0, 0, 1, 1], [], []>} : vector<8x128xf32>, vector<128x512xf32>, vector<8x512xf32> -> vector<8x512xf32>
    %123 = arith.addf %120, %122 : vector<8x512xf32>
    %124 = vector.extract_strided_slice %123 {offsets = [0, 0], sizes = [8, 384], strides = [1, 1]} : vector<8x512xf32> to vector<8x384xf32>
    %cst_49 = arith.constant 5.000000e-01 : f32
    %125 = vector.broadcast %cst_49 : f32 to vector<8x384xf32>
    %126 = arith.mulf %125, %124 : vector<8x384xf32>
    %127 = math.tanh %126 : vector<8x384xf32>
    %cst_50 = arith.constant 1.000000e+00 : f32
    %128 = vector.broadcast %cst_50 : f32 to vector<8x384xf32>
    %129 = arith.addf %128, %127 : vector<8x384xf32>
    %cst_51 = arith.constant 5.000000e-01 : f32
    %130 = vector.broadcast %cst_51 : f32 to vector<8x384xf32>
    %131 = arith.mulf %130, %129 : vector<8x384xf32>
    %132 = vector.extract_strided_slice %131 {offsets = [0, 0], sizes = [8, 128], strides = [1, 1]} : vector<8x384xf32> to vector<8x128xf32>
    %133 = vector.extract_strided_slice %131 {offsets = [0, 128], sizes = [8, 128], strides = [1, 1]} : vector<8x384xf32> to vector<8x128xf32>
    %134 = vector.extract_strided_slice %131 {offsets = [0, 256], sizes = [8, 128], strides = [1, 1]} : vector<8x384xf32> to vector<8x128xf32>
    %135 = vector.extract_strided_slice %123 {offsets = [0, 384], sizes = [8, 128], strides = [1, 1]} : vector<8x512xf32> to vector<8x128xf32>
    %136 = math.tanh %135 : vector<8x128xf32>
    %137 = arith.mulf %133, %112 : vector<8x128xf32>
    %138 = arith.mulf %132, %136 : vector<8x128xf32>
    %139 = arith.addf %137, %138 : vector<8x128xf32>
    %140 = math.tanh %139 : vector<8x128xf32>
    %141 = arith.mulf %134, %140 : vector<8x128xf32>
    %142 = arith.index_cast %118 : i32 to index
    %c0_52 = arith.constant 0 : index
    %143 = vector.load %arg9[%142, %c0_52] : memref<64x128xf32, #tpu.memory_space<vmem>>, vector<8x128xf32>
    tpu.vector_store %arg9[%142, %c0_52], %141 {strides = array<i32>} : memref<64x128xf32, #tpu.memory_space<vmem>>, vector<8x128xf32>,
    %c5_i32 = arith.constant 5 : i32
    %c8_i32_53 = arith.constant 8 : i32
    %144 = arith.muli %c5_i32, %c8_i32_53 : i32
    %145 = tpu.assume_multiple %144, 8 : i32
    %146 = arith.index_cast %145 : i32 to index
    %c0_54 = arith.constant 0 : index
    %147 = vector.load %arg8[%146, %c0_54] : memref<64x512xf32, #tpu.memory_space<vmem>>, vector<8x512xf32>
    %c0_55 = arith.constant 0 : index
    %c0_56 = arith.constant 0 : index
    %148 = vector.load %arg3[%c0_55, %c0_56] : memref<128x512xf32, #tpu.memory_space<vmem>>, vector<128x512xf32>
    %cst_57 = arith.constant dense<0.000000e+00> : vector<8x512xf32>
    %149 = tpu.matmul %141, %148, %cst_57 {dimension_numbers = #tpu.dot_dimension_numbers<[1], [0], [0], [1], [0, 0, 1, 1], [], []>} : vector<8x128xf32>, vector<128x512xf32>, vector<8x512xf32> -> vector<8x512xf32>
    %150 = arith.addf %147, %149 : vector<8x512xf32>
    %151 = vector.extract_strided_slice %150 {offsets = [0, 0], sizes = [8, 384], strides = [1, 1]} : vector<8x512xf32> to vector<8x384xf32>
    %cst_58 = arith.constant 5.000000e-01 : f32
    %152 = vector.broadcast %cst_58 : f32 to vector<8x384xf32>
    %153 = arith.mulf %152, %151 : vector<8x384xf32>
    %154 = math.tanh %153 : vector<8x384xf32>
    %cst_59 = arith.constant 1.000000e+00 : f32
    %155 = vector.broadcast %cst_59 : f32 to vector<8x384xf32>
    %156 = arith.addf %155, %154 : vector<8x384xf32>
    %cst_60 = arith.constant 5.000000e-01 : f32
    %157 = vector.broadcast %cst_60 : f32 to vector<8x384xf32>
    %158 = arith.mulf %157, %156 : vector<8x384xf32>
    %159 = vector.extract_strided_slice %158 {offsets = [0, 0], sizes = [8, 128], strides = [1, 1]} : vector<8x384xf32> to vector<8x128xf32>
    %160 = vector.extract_strided_slice %158 {offsets = [0, 128], sizes = [8, 128], strides = [1, 1]} : vector<8x384xf32> to vector<8x128xf32>
    %161 = vector.extract_strided_slice %158 {offsets = [0, 256], sizes = [8, 128], strides = [1, 1]} : vector<8x384xf32> to vector<8x128xf32>
    %162 = vector.extract_strided_slice %150 {offsets = [0, 384], sizes = [8, 128], strides = [1, 1]} : vector<8x512xf32> to vector<8x128xf32>
    %163 = math.tanh %162 : vector<8x128xf32>
    %164 = arith.mulf %160, %139 : vector<8x128xf32>
    %165 = arith.mulf %159, %163 : vector<8x128xf32>
    %166 = arith.addf %164, %165 : vector<8x128xf32>
    %167 = math.tanh %166 : vector<8x128xf32>
    %168 = arith.mulf %161, %167 : vector<8x128xf32>
    %169 = arith.index_cast %145 : i32 to index
    %c0_61 = arith.constant 0 : index
    %170 = vector.load %arg9[%169, %c0_61] : memref<64x128xf32, #tpu.memory_space<vmem>>, vector<8x128xf32>
    tpu.vector_store %arg9[%169, %c0_61], %168 {strides = array<i32>} : memref<64x128xf32, #tpu.memory_space<vmem>>, vector<8x128xf32>,
    %c6_i32 = arith.constant 6 : i32
    %c8_i32_62 = arith.constant 8 : i32
    %171 = arith.muli %c6_i32, %c8_i32_62 : i32
    %172 = tpu.assume_multiple %171, 8 : i32
    %173 = arith.index_cast %172 : i32 to index
    %c0_63 = arith.constant 0 : index
    %174 = vector.load %arg8[%173, %c0_63] : memref<64x512xf32, #tpu.memory_space<vmem>>, vector<8x512xf32>
    %c0_64 = arith.constant 0 : index
    %c0_65 = arith.constant 0 : index
    %175 = vector.load %arg3[%c0_64, %c0_65] : memref<128x512xf32, #tpu.memory_space<vmem>>, vector<128x512xf32>
    %cst_66 = arith.constant dense<0.000000e+00> : vector<8x512xf32>
    %176 = tpu.matmul %168, %175, %cst_66 {dimension_numbers = #tpu.dot_dimension_numbers<[1], [0], [0], [1], [0, 0, 1, 1], [], []>} : vector<8x128xf32>, vector<128x512xf32>, vector<8x512xf32> -> vector<8x512xf32>
    %177 = arith.addf %174, %176 : vector<8x512xf32>
    %178 = vector.extract_strided_slice %177 {offsets = [0, 0], sizes = [8, 384], strides = [1, 1]} : vector<8x512xf32> to vector<8x384xf32>
    %cst_67 = arith.constant 5.000000e-01 : f32
    %179 = vector.broadcast %cst_67 : f32 to vector<8x384xf32>
    %180 = arith.mulf %179, %178 : vector<8x384xf32>
    %181 = math.tanh %180 : vector<8x384xf32>
    %cst_68 = arith.constant 1.000000e+00 : f32
    %182 = vector.broadcast %cst_68 : f32 to vector<8x384xf32>
    %183 = arith.addf %182, %181 : vector<8x384xf32>
    %cst_69 = arith.constant 5.000000e-01 : f32
    %184 = vector.broadcast %cst_69 : f32 to vector<8x384xf32>
    %185 = arith.mulf %184, %183 : vector<8x384xf32>
    %186 = vector.extract_strided_slice %185 {offsets = [0, 0], sizes = [8, 128], strides = [1, 1]} : vector<8x384xf32> to vector<8x128xf32>
    %187 = vector.extract_strided_slice %185 {offsets = [0, 128], sizes = [8, 128], strides = [1, 1]} : vector<8x384xf32> to vector<8x128xf32>
    %188 = vector.extract_strided_slice %185 {offsets = [0, 256], sizes = [8, 128], strides = [1, 1]} : vector<8x384xf32> to vector<8x128xf32>
    %189 = vector.extract_strided_slice %177 {offsets = [0, 384], sizes = [8, 128], strides = [1, 1]} : vector<8x512xf32> to vector<8x128xf32>
    %190 = math.tanh %189 : vector<8x128xf32>
    %191 = arith.mulf %187, %166 : vector<8x128xf32>
    %192 = arith.mulf %186, %190 : vector<8x128xf32>
    %193 = arith.addf %191, %192 : vector<8x128xf32>
    %194 = math.tanh %193 : vector<8x128xf32>
    %195 = arith.mulf %188, %194 : vector<8x128xf32>
    %196 = arith.index_cast %172 : i32 to index
    %c0_70 = arith.constant 0 : index
    %197 = vector.load %arg9[%196, %c0_70] : memref<64x128xf32, #tpu.memory_space<vmem>>, vector<8x128xf32>
    tpu.vector_store %arg9[%196, %c0_70], %195 {strides = array<i32>} : memref<64x128xf32, #tpu.memory_space<vmem>>, vector<8x128xf32>,
    %c7_i32 = arith.constant 7 : i32
    %c8_i32_71 = arith.constant 8 : i32
    %198 = arith.muli %c7_i32, %c8_i32_71 : i32
    %199 = tpu.assume_multiple %198, 8 : i32
    %200 = arith.index_cast %199 : i32 to index
    %c0_72 = arith.constant 0 : index
    %201 = vector.load %arg8[%200, %c0_72] : memref<64x512xf32, #tpu.memory_space<vmem>>, vector<8x512xf32>
    %c0_73 = arith.constant 0 : index
    %c0_74 = arith.constant 0 : index
    %202 = vector.load %arg3[%c0_73, %c0_74] : memref<128x512xf32, #tpu.memory_space<vmem>>, vector<128x512xf32>
    %cst_75 = arith.constant dense<0.000000e+00> : vector<8x512xf32>
    %203 = tpu.matmul %195, %202, %cst_75 {dimension_numbers = #tpu.dot_dimension_numbers<[1], [0], [0], [1], [0, 0, 1, 1], [], []>} : vector<8x128xf32>, vector<128x512xf32>, vector<8x512xf32> -> vector<8x512xf32>
    %204 = arith.addf %201, %203 : vector<8x512xf32>
    %205 = vector.extract_strided_slice %204 {offsets = [0, 0], sizes = [8, 384], strides = [1, 1]} : vector<8x512xf32> to vector<8x384xf32>
    %cst_76 = arith.constant 5.000000e-01 : f32
    %206 = vector.broadcast %cst_76 : f32 to vector<8x384xf32>
    %207 = arith.mulf %206, %205 : vector<8x384xf32>
    %208 = math.tanh %207 : vector<8x384xf32>
    %cst_77 = arith.constant 1.000000e+00 : f32
    %209 = vector.broadcast %cst_77 : f32 to vector<8x384xf32>
    %210 = arith.addf %209, %208 : vector<8x384xf32>
    %cst_78 = arith.constant 5.000000e-01 : f32
    %211 = vector.broadcast %cst_78 : f32 to vector<8x384xf32>
    %212 = arith.mulf %211, %210 : vector<8x384xf32>
    %213 = vector.extract_strided_slice %212 {offsets = [0, 0], sizes = [8, 128], strides = [1, 1]} : vector<8x384xf32> to vector<8x128xf32>
    %214 = vector.extract_strided_slice %212 {offsets = [0, 128], sizes = [8, 128], strides = [1, 1]} : vector<8x384xf32> to vector<8x128xf32>
    %215 = vector.extract_strided_slice %212 {offsets = [0, 256], sizes = [8, 128], strides = [1, 1]} : vector<8x384xf32> to vector<8x128xf32>
    %216 = vector.extract_strided_slice %204 {offsets = [0, 384], sizes = [8, 128], strides = [1, 1]} : vector<8x512xf32> to vector<8x128xf32>
    %217 = math.tanh %216 : vector<8x128xf32>
    %218 = arith.mulf %214, %193 : vector<8x128xf32>
    %219 = arith.mulf %213, %217 : vector<8x128xf32>
    %220 = arith.addf %218, %219 : vector<8x128xf32>
    %221 = math.tanh %220 : vector<8x128xf32>
    %222 = arith.mulf %215, %221 : vector<8x128xf32>
    %223 = arith.index_cast %199 : i32 to index
    %c0_79 = arith.constant 0 : index
    %224 = vector.load %arg9[%223, %c0_79] : memref<64x128xf32, #tpu.memory_space<vmem>>, vector<8x128xf32>
    tpu.vector_store %arg9[%223, %c0_79], %222 {strides = array<i32>} : memref<64x128xf32, #tpu.memory_space<vmem>>, vector<8x128xf32>,
    %c8_i32_80 = arith.constant 8 : i32
    %c0_81 = arith.constant 0 : index
    %c0_82 = arith.constant 0 : index
    %225 = vector.load %arg9[%c0_81, %c0_82] : memref<64x128xf32, #tpu.memory_space<vmem>>, vector<64x128xf32>
    %c0_83 = arith.constant 0 : index
    %c0_84 = arith.constant 0 : index
    %226 = vector.load %arg5[%c0_83, %c0_84] : memref<128x128xf32, #tpu.memory_space<vmem>>, vector<128x128xf32>
    %cst_85 = arith.constant dense<0.000000e+00> : vector<64x128xf32>
    %227 = tpu.matmul %225, %226, %cst_85 {dimension_numbers = #tpu.dot_dimension_numbers<[1], [0], [0], [1], [0, 0, 1, 1], [], []>} : vector<64x128xf32>, vector<128x128xf32>, vector<64x128xf32> -> vector<64x128xf32>
    %c0_86 = arith.constant 0 : index
    %c0_87 = arith.constant 0 : index
    %228 = vector.load %arg6[%c0_86, %c0_87] : memref<1x128xf32, #tpu.memory_space<vmem>>, vector<1x128xf32>
    %229 = vector.broadcast %228 : vector<1x128xf32> to vector<64x128xf32>
    %230 = arith.addf %227, %229 : vector<64x128xf32>
    %c0_88 = arith.constant 0 : index
    %c0_89 = arith.constant 0 : index
    %231 = vector.load %arg7[%c0_88, %c0_89] : memref<64x128xf32, #tpu.memory_space<vmem>>, vector<64x128xf32>
    tpu.vector_store %arg7[%c0_88, %c0_89], %230 {strides = array<i32>} : memref<64x128xf32, #tpu.memory_space<vmem>>, vector<64x128xf32>,
    return
  }
  func.func @transform_0(%arg0: i32) -> (i32, i32) {
    %c0_i32 = arith.constant 0 : i32
    %c0_i32_0 = arith.constant 0 : i32
    return %arg0, %c0_i32 : i32, i32
  }
  func.func @transform_1(%arg0: i32) -> (i32, i32) {
    %c0_i32 = arith.constant 0 : i32
    %c0_i32_0 = arith.constant 0 : i32
    %c0_i32_1 = arith.constant 0 : i32
    return %c0_i32, %c0_i32_0 : i32, i32
  }
  func.func @transform_2(%arg0: i32) -> (i32, i32) {
    %c0_i32 = arith.constant 0 : i32
    %c0_i32_0 = arith.constant 0 : i32
    %c0_i32_1 = arith.constant 0 : i32
    return %c0_i32, %c0_i32_0 : i32, i32
  }
  func.func @transform_3(%arg0: i32) -> (i32, i32) {
    %c0_i32 = arith.constant 0 : i32
    %c0_i32_0 = arith.constant 0 : i32
    %c0_i32_1 = arith.constant 0 : i32
    return %c0_i32, %c0_i32_0 : i32, i32
  }
  func.func @transform_4(%arg0: i32) -> (i32, i32) {
    %c0_i32 = arith.constant 0 : i32
    %c0_i32_0 = arith.constant 0 : i32
    %c0_i32_1 = arith.constant 0 : i32
    return %c0_i32, %c0_i32_0 : i32, i32
  }
  func.func @transform_5(%arg0: i32) -> (i32, i32) {
    %c0_i32 = arith.constant 0 : i32
    %c0_i32_0 = arith.constant 0 : i32
    %c0_i32_1 = arith.constant 0 : i32
    return %c0_i32, %c0_i32_0 : i32, i32
  }
  func.func @transform_6(%arg0: i32) -> (i32, i32) {
    %c0_i32 = arith.constant 0 : i32
    %c0_i32_0 = arith.constant 0 : i32
    return %arg0, %c0_i32 : i32, i32
  }
}

</mosaic_0001>

<bundles_post_ra>
// kernel: tpu_custom_call.1
= control target key start
LH: loop header
LB: loop body
LE: loop exit
PB: predicated region body
PF: predicated region fallthrough
CT: control target
= control target key end

     0   :  { %11 = vsyncpa [#allocation5], 0  ;;  %s3791_s0 = inlined_call_operand.hbm [shape: f32[64,64], index: 0, kind: input, shape index: {}]   ;;  %s3792_s1 = inlined_call_operand.hbm [shape: f32[64,512], index: 1, kind: input, shape index: {}]   ;;  %s3793_s2 = inlined_call_operand.hbm [shape: f32[128,512], index: 2, kind: input, shape index: {}]   ;;  %s3794_s3 = inlined_call_operand.vmem [shape: f32[1,512], index: 3, kind: input, shape index: {}]   ;;  %s3795_s4 = inlined_call_operand.hbm [shape: f32[128,128], index: 4, kind: input, shape index: {}]   ;;  %s3796_s5 = inlined_call_operand.vmem [shape: f32[1,128], index: 5, kind: input, shape index: {}]   ;;  %s3797_s6 = inlined_call_operand.hbm [shape: f32[64,128], index: 6, kind: output, shape index: {}]  }
   0x1   :  { %12 = vsyncpa [#allocation8], 0 }
   0x2   :  { %13 = vsyncpa [#allocation11], 0 }
   0x3   :  { %14 = vsyncpa [#allocation6], 0  ;;  %s2772_s21 = smov [#allocation7]  }
   0x4   :  { %s32_s22 = sshll.u32 %s2772_s21, 4  ;;  %s33_s22 = int_to_ptr.vmem [resolvable:$true] %s32_s22 }
   0x5   :  { %s2672_s23 = scalar_lea.vmem %s33_s22, 4096  ;;  %p2677_p1 = scmp.lt.s32.totalorder %s33_s22, %s33_s22 }
   0x6   :  { %p2673_p0 = scmp.ne.s32.totalorder %s33_s22, %s2672_s23  ;;  %p2678_p2 = scmp.lt.s32.totalorder %s2672_s23, %s2672_s23 }
   0x8   :  { %p2679_p3 = por %p2678_p2, %p2677_p1 }
   0xa   :  { %p2680_p4 = pnand %p2679_p3, %p2673_p0 }
   0xc   :  { %2683 = shalt.err (!%p2680_p4)
}
   0xd   :  { %s2773_s24 = smov 512   ;;  %s2774_s25 = smov 32  }
   0xe   :  { %38 = dma.hbm_to_vmem [thread:$0]  %s3792_s1, 4096, %s33_s22, [#allocation8], %s2773_s24, %s2773_s24, %s2774_s25  }
   0xf   :  { %s2775_s28 = smov [#allocation4]  }
  0x10   :  { %s20_s29 = sshll.u32 %s2775_s28, 4  ;;  %s21_s29 = int_to_ptr.vmem [resolvable:$true] %s20_s29 }
  0x11   :  { %s2692_s30 = scalar_lea.vmem %s21_s29, 1024  ;;  %p2697_p6 = scmp.lt.s32.totalorder %s21_s29, %s21_s29 }
  0x12   :  { %p2693_p5 = scmp.ne.s32.totalorder %s21_s29, %s2692_s30  ;;  %p2698_p7 = scmp.lt.s32.totalorder %s2692_s30, %s2692_s30 }
  0x14   :  { %p2699_p8 = por %p2698_p7, %p2697_p6 }
  0x16   :  { %p2700_p9 = pnand %p2699_p8, %p2693_p5 }
  0x18   :  { %2703 = shalt.err (!%p2700_p9)
}
  0x19   :  { %s2776_s7 = smov 128   ;;  %s2777_s8 = smov 8  }
  0x1a   :  { %26 = dma.hbm_to_vmem [thread:$0]  %s3791_s0, 1024, %s21_s29, [#allocation5], %s2776_s7, %s2776_s7, %s2777_s8  }
  0x1b   :  { %s2778_s1 = smov [#allocation9]   ;;  %s2779_s12 = smov [#allocation10]  }
  0x1c   :  { %s44_s11 = sshll.u32 %s2778_s1, 4  ;;  %s58_s13 = sshll.u32 %s2779_s12, 4  ;;  %s45_s11 = int_to_ptr.vmem [resolvable:$true] %s44_s11  ;;  %s59_s13 = int_to_ptr.vmem [resolvable:$true] %s58_s13 }
  0x1d   :  { %s2712_s14 = scalar_lea.vmem %s45_s11, 8192  ;;  %p2717_p11 = scmp.lt.s32.totalorder %s45_s11, %s45_s11 }
  0x1e   :  { %p2713_p10 = scmp.ne.s32.totalorder %s45_s11, %s2712_s14  ;;  %p2718_p12 = scmp.lt.s32.totalorder %s2712_s14, %s2712_s14 }
  0x20   :  { %p2719_p13 = por %p2718_p12, %p2717_p11 }
  0x22   :  { %p2720_p0 = pnand %p2719_p13, %p2713_p10 }
  0x24   :  { %2723 = shalt.err (!%p2720_p0)
}
  0x25   :  { %50 = dma.hbm_to_vmem [thread:$0]  %s3793_s2, 8192, %s45_s11, [#allocation8], %s2773_s24, %s2773_s24, %s2774_s25  }
  0x26   :  { %s2732_s0 = scalar_lea.vmem %s59_s13, 2048  ;;  %p2737_p2 = scmp.lt.s32.totalorder %s59_s13, %s59_s13 }
  0x27   :  { %p2733_p1 = scmp.ne.s32.totalorder %s59_s13, %s2732_s0  ;;  %p2738_p3 = scmp.lt.s32.totalorder %s2732_s0, %s2732_s0 }
  0x29   :  { %p2739_p4 = por %p2738_p3, %p2737_p2 }
  0x2b   :  { %p2740_p5 = pnand %p2739_p4, %p2733_p1 }
  0x2d   :  { %2743 = shalt.err (!%p2740_p5)
}
  0x2e   :  { %64 = dma.hbm_to_vmem [thread:$0]  %s3795_s4, 2048, %s59_s13, [#allocation11], %s2776_s7, %s2776_s7, %s2777_s8  }
  0x2f   :  { %2764 = dma.done.wait [#allocation5], 1024  }
  0x30   :  { %2765 = vsyncadd [#allocation5], 4294966272 }
  0x31   :  { %2766 = dma.done.wait [#allocation8], 12288  }
  0x32   :  { %2767 = vsyncadd [#allocation8], 4294955008 }
  0x33   :  { %2768 = dma.done.wait [#allocation11], 2048  }
  0x34   :  { %2769 = vsyncadd [#allocation11], 4294965248  ;;  %v3800_v0 = vmov 0.0   ;;  %v116_v1 = vld [vmem:[#allocation7 + $0xe8] sm:$0xff]  ;;  %v115_v3 = vld [vmem:[#allocation7 + $0xe0] sm:$0xff]  ;;  %vm141_vm0 = vcmask 523264  }
  0x35   :  { %230 = vmatprep.mubr.f32.mxu1 %v3800_v0  ;;  %559 = vmatprep.mubr.f32.mxu0 %v3800_v0  ;;  %v2843_v2 = vld [vmem:[#allocation9 + $0x1e8] sm:$0xff]  ;;  %v2846_v4 = vld [vmem:[#allocation9 + $0x1e0] sm:$0xff]  ;;  %v118_v34 = vld [vmem:[#allocation7 + $0xf8] sm:$0xff] }
  0x36   :  { %182 = vmatprep.subr.mxu1 %v116_v1  ;;  %495 = vmatprep.subr.mxu0 %v2843_v2  ;;  %v112_v5 = vld [vmem:[#allocation7 + $0xc8] sm:$0xff]  ;;  %v111_v7 = vld [vmem:[#allocation7 + $0xc0] sm:$0xff]  ;;  %v117_v36 = vld [vmem:[#allocation7 + $0xf0] sm:$0xff] }
  0x37   :  { %v2848_v6 = vld [vmem:[#allocation9 + $0x1c8] sm:$0xff]  ;;  %183 = vmatpush1.msra.mxu1 %v115_v3  ;;  %496 = vmatpush1.msra.mxu0 %v2846_v4  ;;  %v2851_v8 = vld [vmem:[#allocation9 + $0x1c0] sm:$0xff]  ;;  %v114_v39 = vld [vmem:[#allocation7 + $0xd8] sm:$0xff] }
  0x38   :  { %v108_v9 = vld [vmem:[#allocation7 + $0xa8] sm:$0xff]  ;;  %184 = vmatprep.subr.mxu1 %v112_v5  ;;  %497 = vmatprep.subr.mxu0 %v2848_v6  ;;  %v107_v11 = vld [vmem:[#allocation7 + $0xa0] sm:$0xff]  ;;  %v113_v43 = vld [vmem:[#allocation7 + $0xd0] sm:$0xff] }
  0x39   :  { %v2854_v10 = vld [vmem:[#allocation9 + $0x1a8] sm:$0xff]  ;;  %v2856_v12 = vld [vmem:[#allocation9 + $0x1a0] sm:$0xff]  ;;  %185 = vmatpush1.msra.mxu1 %v111_v7  ;;  %498 = vmatpush1.msra.mxu0 %v2851_v8  ;;  %v110_v46 = vld [vmem:[#allocation7 + $0xb8] sm:$0xff] }
  0x3a   :  { %v104_v13 = vld [vmem:[#allocation7 + $0x88] sm:$0xff]  ;;  %186 = vmatprep.subr.mxu1 %v108_v9  ;;  %499 = vmatprep.subr.mxu0 %v2854_v10  ;;  %v103_v15 = vld [vmem:[#allocation7 + $0x80] sm:$0xff]  ;;  %v2921_v48 = vld [vmem:[#allocation4 + $0x10] sm:$0xff] }
  0x3b   :  { %v2859_v14 = vld [vmem:[#allocation9 + $0x188] sm:$0xff]  ;;  %v2862_v16 = vld [vmem:[#allocation9 + $0x180] sm:$0xff]  ;;  %187 = vmatpush1.msra.mxu1 %v107_v11  ;;  %500 = vmatpush1.msra.mxu0 %v2856_v12  ;;  %v109_v50 = vld [vmem:[#allocation7 + $0xb0] sm:$0xff] }
  0x3c   :  { %v100_v17 = vld [vmem:[#allocation7 + $0x68] sm:$0xff]  ;;  %188 = vmatprep.subr.mxu1 %v104_v13  ;;  %501 = vmatprep.subr.mxu0 %v2859_v14  ;;  %v99_v19 = vld [vmem:[#allocation7 + $0x60] sm:$0xff]  ;;  %v106_v53 = vld [vmem:[#allocation7 + $0x98] sm:$0xff] }
  0x3d   :  { %v2865_v18 = vld [vmem:[#allocation9 + $0x168] sm:$0xff]  ;;  %v2868_v20 = vld [vmem:[#allocation9 + $0x160] sm:$0xff]  ;;  %189 = vmatpush1.msra.mxu1 %v103_v15  ;;  %502 = vmatpush1.msra.mxu0 %v2862_v16  ;;  %v2938_v55 = vld [vmem:[#allocation4 + $0x18] sm:$0xff] }
  0x3e   :  { %v96_v21 = vld [vmem:[#allocation7 + $0x48] sm:$0xff]  ;;  %190 = vmatprep.subr.mxu1 %v100_v17  ;;  %503 = vmatprep.subr.mxu0 %v2865_v18  ;;  %v95_v23 = vld [vmem:[#allocation7 + $0x40] sm:$0xff]  ;;  %v105_v57 = vld [vmem:[#allocation7 + $0x90] sm:$0xff] }
  0x3f   :  { %v2871_v22 = vld [vmem:[#allocation9 + $0x148] sm:$0xff]  ;;  %v2874_v24 = vld [vmem:[#allocation9 + $0x140] sm:$0xff]  ;;  %191 = vmatpush1.msra.mxu1 %v99_v19  ;;  %504 = vmatpush1.msra.mxu0 %v2868_v20  ;;  %v102_v60 = vld [vmem:[#allocation7 + $0x78] sm:$0xff] }
  0x40   :  { %v92_v25 = vld [vmem:[#allocation7 + $0x28] sm:$0xff]  ;;  %192 = vmatprep.subr.mxu1 %v96_v21  ;;  %505 = vmatprep.subr.mxu0 %v2871_v22  ;;  %v91_v27 = vld [vmem:[#allocation7 + $0x20] sm:$0xff]  ;;  %v101_v63 = vld [vmem:[#allocation7 + $0x70] sm:$0xff] }
  0x41   :  { %v2877_v26 = vld [vmem:[#allocation9 + $0x128] sm:$0xff]  ;;  %v2880_v28 = vld [vmem:[#allocation9 + $0x120] sm:$0xff]  ;;  %193 = vmatpush1.msra.mxu1 %v95_v23  ;;  %506 = vmatpush1.msra.mxu0 %v2874_v24  ;;  %v98_v1 = vld [vmem:[#allocation7 + $0x58] sm:$0xff] }
  0x42   :  { %v88_v29 = vld [vmem:[#allocation7 + $0x8] sm:$0xff]  ;;  %194 = vmatprep.subr.mxu1 %v92_v25  ;;  %507 = vmatprep.subr.mxu0 %v2877_v26  ;;  %v87_v31 = vld [vmem:[#allocation7] sm:$0xff]  ;;  %v97_v3 = vld [vmem:[#allocation7 + $0x50] sm:$0xff] }
  0x43   :  { %v2883_v30 = vld [vmem:[#allocation9 + $0x108] sm:$0xff]  ;;  %v2886_v32 = vld [vmem:[#allocation9 + $0x100] sm:$0xff]  ;;  %195 = vmatpush1.msra.mxu1 %v91_v27  ;;  %508 = vmatpush1.msra.mxu0 %v2880_v28  ;;  %v94_v7 = vld [vmem:[#allocation7 + $0x38] sm:$0xff] }
  0x44   :  { %v2889_v33 = vld [vmem:[#allocation4] sm:$0xff]  ;;  %196 = vmatprep.subr.mxu1 %v88_v29  ;;  %509 = vmatprep.subr.mxu0 %v2883_v30  ;;  %v2892_v35 = vld [vmem:[#allocation9 + $0xe8] sm:$0xff]  ;;  %v93_v9 = vld [vmem:[#allocation7 + $0x30] sm:$0xff] }
  0x45   :  { %197 = vmatpush1.msra.mxu1 %v87_v31  ;;  %510 = vmatpush1.msra.mxu0 %v2886_v32  ;;  %v2895_v37 = vld [vmem:[#allocation9 + $0xe0] sm:$0xff]  ;;  %v2899_v38 = vld [vmem:[#allocation9 + $0xc8] sm:$0xff]  ;;  %v90_v11 = vld [vmem:[#allocation7 + $0x18] sm:$0xff] }
  0x46   :  { %2489 = vmatmul.mubr.msk.f32.vlgmr.msra.gmra.mxu1 %vm141_vm0, %v2889_v33  ;;  %295 = vmatprep.subr.mxu1 %v118_v34  ;;  %v2902_v40 = vld [vmem:[#allocation9 + $0xc0] sm:$0xff]  ;;  %v2904_v41 = vld [vmem:[#allocation4 + $0x8] sm:$0xff]  ;;  %v89_v13 = vld [vmem:[#allocation7 + $0x10] sm:$0xff] }
  0x47   :  { %511 = vmatprep.subr.mxu0 %v2892_v35  ;;  %296 = vmatpush1.msra.mxu1 %v117_v36  ;;  %v2908_v42 = vld [vmem:[#allocation9 + $0xa8] sm:$0xff]  ;;  %v2911_v44 = vld [vmem:[#allocation9 + $0xa0] sm:$0xff]  ;;  %v2971_v15 = vld [vmem:[#allocation4 + $0x30] sm:$0xff] }
  0x48   :  { %512 = vmatpush1.msra.mxu0 %v2895_v37  ;;  %236 = vmatprep.mubr.f32.mxu1 %v3800_v0  ;;  %3876 = vst [vmem:[#allocation17_spill] sm:$0xff] %v2908_v42  ;;  %3877 = vst [vmem:[#allocation18_spill] sm:$0xff] %v2911_v44  ;;  %v2916_v45 = vld [vmem:[#allocation9 + $0x88] sm:$0xff]  ;;  %v2919_v47 = vld [vmem:[#allocation9 + $0x80] sm:$0xff] }
  0x49   :  { %513 = vmatprep.subr.mxu0 %v2899_v38  ;;  %297 = vmatprep.subr.mxu1 %v114_v39  ;;  %3878 = vst [vmem:[#allocation19_spill] sm:$0xff] %v2916_v45  ;;  %3879 = vst [vmem:[#allocation20_spill] sm:$0xff] %v2919_v47  ;;  %v2925_v49 = vld [vmem:[#allocation9 + $0x68] sm:$0xff]  ;;  %v2928_v51 = vld [vmem:[#allocation9 + $0x60] sm:$0xff] }
  0x4a   :  { %514 = vmatpush1.msra.mxu0 %v2902_v40  ;;  %2490 = vmatmul.mubr.msk.f32.gmra.mxu1 %vm141_vm0, %v2904_v41  ;;  %3880 = vst [vmem:[#allocation21_spill] sm:$0xff] %v2925_v49  ;;  %3881 = vst [vmem:[#allocation22_spill] sm:$0xff] %v2928_v51  ;;  %v2933_v52 = vld [vmem:[#allocation9 + $0x48] sm:$0xff]  ;;  %v2936_v54 = vld [vmem:[#allocation9 + $0x40] sm:$0xff] }
  0x4b   :  { %515 = vmatprep.subr.mxu0 %v2908_v42  ;;  %298 = vmatpush1.msra.mxu1 %v113_v43  ;;  %3882 = vst [vmem:[#allocation23_spill] sm:$0xff] %v2933_v52  ;;  %3883 = vst [vmem:[#allocation24_spill] sm:$0xff] %v2936_v54  ;;  %v2942_v56 = vld [vmem:[#allocation9 + $0x28] sm:$0xff]  ;;  %v2945_v58 = vld [vmem:[#allocation9 + $0x20] sm:$0xff] }
  0x4c   :  { %516 = vmatpush1.msra.mxu0 %v2911_v44  ;;  %242 = vmatprep.mubr.f32.mxu1 %v3800_v0  ;;  %3884 = vst [vmem:[#allocation25_spill] sm:$0xff] %v2942_v56  ;;  %3885 = vst [vmem:[#allocation26_spill] sm:$0xff] %v2945_v58  ;;  %v2950_v59 = vld [vmem:[#allocation9 + $0x8] sm:$0xff]  ;;  %v2953_v61 = vld [vmem:[#allocation9] sm:$0xff] }
  0x4d   :  { %517 = vmatprep.subr.mxu0 %v2916_v45  ;;  %299 = vmatprep.subr.mxu1 %v110_v46  ;;  %3886 = vst [vmem:[#allocation27_spill] sm:$0xff] %v2950_v59  ;;  %3887 = vst [vmem:[#allocation28_spill] sm:$0xff] %v2953_v61  ;;  %v2955_v62 = vld [vmem:[#allocation4 + $0x20] sm:$0xff]  ;;  %v2964_v5 = vld [vmem:[#allocation4 + $0x28] sm:$0xff] }
  0x4e   :  { %518 = vmatpush1.msra.mxu0 %v2919_v47  ;;  %2491 = vmatmul.mubr.msk.f32.gmra.mxu1 %vm141_vm0, %v2921_v48  ;;  %v2973_v17 = vld [vmem:[#allocation9 + $0x1f8] sm:$0xff]  ;;  %v2992_v21 = vld [vmem:[#allocation9 + $0x1f0] sm:$0xff] }
  0x4f   :  { %519 = vmatprep.subr.mxu0 %v2925_v49  ;;  %300 = vmatpush1.msra.mxu1 %v109_v50  ;;  %3888 = vst [vmem:[#allocation29_spill] sm:$0xff] %v2973_v17  ;;  %v2981_v19 = vld [vmem:[#allocation4 + $0x38] sm:$0xff]  ;;  %v3000_v25 = vld [vmem:[#allocation9 + $0x1d0] sm:$0xff] }
  0x50   :  { %520 = vmatpush1.msra.mxu0 %v2928_v51  ;;  %248 = vmatprep.mubr.f32.mxu1 %v3800_v0  ;;  %v2995_v23 = vld [vmem:[#allocation9 + $0x1d8] sm:$0xff]  ;;  %v3008_v29 = vld [vmem:[#allocation9 + $0x1b0] sm:$0xff] }
  0x51   :  { %521 = vmatprep.subr.mxu0 %v2933_v52  ;;  %301 = vmatprep.subr.mxu1 %v106_v53  ;;  %v3005_v27 = vld [vmem:[#allocation9 + $0x1b8] sm:$0xff]  ;;  %v3025_v36 = vld [vmem:[#allocation9 + $0x170] sm:$0xff] }
  0x52   :  { %522 = vmatpush1.msra.mxu0 %v2936_v54  ;;  %2492 = vmatmul.mubr.msk.f32.gmra.mxu1 %vm141_vm0, %v2938_v55  ;;  %v3012_v31 = vld [vmem:[#allocation9 + $0x198] sm:$0xff]  ;;  %v3042_v46 = vld [vmem:[#allocation9 + $0x130] sm:$0xff] }
  0x53   :  { %523 = vmatprep.subr.mxu0 %v2942_v56  ;;  %302 = vmatpush1.msra.mxu1 %v105_v57  ;;  %v3022_v34 = vld [vmem:[#allocation9 + $0x178] sm:$0xff]  ;;  %v3059_v57 = vld [vmem:[#allocation9 + $0xf0] sm:$0xff] }
  0x54   :  { %524 = vmatpush1.msra.mxu0 %v2945_v58  ;;  %254 = vmatprep.mubr.f32.mxu1 %v3800_v0  ;;  %v3029_v39 = vld [vmem:[#allocation9 + $0x158] sm:$0xff] }
  0x55   :  { %525 = vmatprep.subr.mxu0 %v2950_v59  ;;  %303 = vmatprep.subr.mxu1 %v102_v60  ;;  %v3039_v43 = vld [vmem:[#allocation9 + $0x138] sm:$0xff] }
  0x56   :  { %526 = vmatpush1.msra.mxu0 %v2953_v61  ;;  %2493 = vmatmul.mubr.msk.f32.gmra.mxu1 %vm141_vm0, %v2955_v62  ;;  %v3046_v50 = vld [vmem:[#allocation9 + $0x118] sm:$0xff] }
  0x57   :  { %560 = vmatmul.mubr.f32.vlgmr.msra.gmra.mxu0 %v3800_v0  ;;  %304 = vmatpush1.msra.mxu1 %v101_v63  ;;  %v3056_v53 = vld [vmem:[#allocation9 + $0xf8] sm:$0xff] }
  0x58   :  { %260 = vmatprep.mubr.f32.mxu1 %v3800_v0  ;;  %305 = vmatprep.subr.mxu1 %v98_v1  ;;  %v3063_v60 = vld [vmem:[#allocation9 + $0xd8] sm:$0xff]  ;;  %v3076_v1 = vld [vmem:[#allocation9 + $0xb0] sm:$0xff] }
  0x59   :  { %306 = vmatpush1.msra.mxu1 %v97_v3  ;;  %731 = vmatprep.subr.mxu0 %v2843_v2  ;;  %v3073_v63 = vld [vmem:[#allocation9 + $0xb8] sm:$0xff]  ;;  %3890 = vst [vmem:[#allocation31_spill] sm:$0xff] %v3076_v1 }
  0x5a   :  { %2494 = vmatmul.mubr.msk.f32.gmra.mxu1 %vm141_vm0, %v2964_v5  ;;  %307 = vmatprep.subr.mxu1 %v94_v7  ;;  %3889 = vst [vmem:[#allocation30_spill] sm:$0xff] %v3073_v63  ;;  %v3080_v3 = vld [vmem:[#allocation9 + $0x98] sm:$0xff] }
  0x5b   :  { %266 = vmatprep.mubr.f32.mxu1 %v3800_v0  ;;  %308 = vmatpush1.msra.mxu1 %v93_v9  ;;  %3891 = vst [vmem:[#allocation32_spill] sm:$0xff] %v3080_v3  ;;  %v3090_v7 = vld [vmem:[#allocation9 + $0x78] sm:$0xff]  ;;  %v3093_v9 = vld [vmem:[#allocation9 + $0x70] sm:$0xff] }
  0x5c   :  { %309 = vmatprep.subr.mxu1 %v90_v11  ;;  %732 = vmatpush1.msra.mxu0 %v2846_v4  ;;  %3893 = vst [vmem:[#allocation34_spill] sm:$0xff] %v3090_v7  ;;  %3894 = vst [vmem:[#allocation35_spill] sm:$0xff] %v3093_v9  ;;  %v3097_v11 = vld [vmem:[#allocation9 + $0x58] sm:$0xff] }
  0x5d   :  { %310 = vmatpush1.msra.mxu1 %v89_v13  ;;  %733 = vmatprep.subr.mxu0 %v2848_v6  ;;  %3895 = vst [vmem:[#allocation36_spill] sm:$0xff] %v3097_v11  ;;  %v3107_v13 = vld [vmem:[#allocation9 + $0x38] sm:$0xff] }
  0x5e   :  { %2495 = vmatmul.mubr.msk.f32.gmra.mxu1 %vm141_vm0, %v2971_v15  ;;  %566 = vmatprep.subr.mxu1 %v2973_v17  ;;  %3897 = vst [vmem:[#allocation38_spill] sm:$0xff] %v3107_v13 }
  0x5f   :  { %272 = vmatprep.mubr.f32.mxu1 %v3800_v0  ;;  %734 = vmatpush1.msra.mxu0 %v2851_v8 }
  0x60   :  { %735 = vmatprep.subr.mxu0 %v2854_v10  ;;  %795 = vmatprep.mubr.f32.mxu0 %v3800_v0 }
  0x61   :  { %736 = vmatpush1.msra.mxu0 %v2856_v12 }
  0x62   :  { %2496 = vmatmul.mubr.msk.f32.gmra.mxu1 %vm141_vm0, %v2981_v19  ;;  %737 = vmatprep.subr.mxu0 %v2859_v14 }
  0x63   :  { %343 = vmatprep.mubr.f32.mxu1 %v3800_v0  ;;  %738 = vmatpush1.msra.mxu0 %v2862_v16 }
  0x64   :  { %739 = vmatprep.subr.mxu0 %v2865_v18 }
  0x65   :  { %740 = vmatpush1.msra.mxu0 %v2868_v20 }
  0x66   :  { %2497 = vmatmul.mubr.msk.f32.vlgmr.msra.gmra.mxu1 %vm141_vm0, %v2889_v33  ;;  %741 = vmatprep.subr.mxu0 %v2871_v22  ;;  %v3018_v33 = vld [vmem:[#allocation9 + $0x190] sm:$0xff] }
  0x67   :  { %567 = vmatpush1.msra.mxu1 %v2992_v21  ;;  %349 = vmatprep.mubr.f32.mxu1 %v3800_v0 }
  0x68   :  { %568 = vmatprep.subr.mxu1 %v2995_v23  ;;  %742 = vmatpush1.msra.mxu0 %v2874_v24 }
  0x69   :  { %569 = vmatpush1.msra.mxu1 %v3000_v25  ;;  %743 = vmatprep.subr.mxu0 %v2877_v26 }
  0x6a   :  { %2498 = vmatmul.mubr.msk.f32.gmra.mxu1 %vm141_vm0, %v2904_v41  ;;  %570 = vmatprep.subr.mxu1 %v3005_v27  ;;  %v3035_v41 = vld [vmem:[#allocation9 + $0x150] sm:$0xff] }
  0x6b   :  { %571 = vmatpush1.msra.mxu1 %v3008_v29  ;;  %355 = vmatprep.mubr.f32.mxu1 %v3800_v0 }
  0x6c   :  { %572 = vmatprep.subr.mxu1 %v3012_v31  ;;  %744 = vmatpush1.msra.mxu0 %v2880_v28 }
  0x6d   :  { %573 = vmatpush1.msra.mxu1 %v3018_v33  ;;  %745 = vmatprep.subr.mxu0 %v2883_v30 }
  0x6e   :  { %2499 = vmatmul.mubr.msk.f32.gmra.mxu1 %vm141_vm0, %v2921_v48  ;;  %574 = vmatprep.subr.mxu1 %v3022_v34  ;;  %v3052_v48 = vld [vmem:[#allocation9 + $0x110] sm:$0xff] }
  0x6f   :  { %575 = vmatpush1.msra.mxu1 %v3025_v36  ;;  %361 = vmatprep.mubr.f32.mxu1 %v3800_v0 }
  0x70   :  { %576 = vmatprep.subr.mxu1 %v3029_v39  ;;  %746 = vmatpush1.msra.mxu0 %v2886_v32 }
  0x71   :  { %577 = vmatpush1.msra.mxu1 %v3035_v41  ;;  %747 = vmatprep.subr.mxu0 %v2892_v35 }
  0x72   :  { %2500 = vmatmul.mubr.msk.f32.gmra.mxu1 %vm141_vm0, %v2938_v55  ;;  %578 = vmatprep.subr.mxu1 %v3039_v43  ;;  %v3069_v55 = vld [vmem:[#allocation9 + $0xd0] sm:$0xff] }
  0x73   :  { %579 = vmatpush1.msra.mxu1 %v3042_v46  ;;  %367 = vmatprep.mubr.f32.mxu1 %v3800_v0 }
  0x74   :  { %580 = vmatprep.subr.mxu1 %v3046_v50  ;;  %748 = vmatpush1.msra.mxu0 %v2895_v37 }
  0x75   :  { %581 = vmatpush1.msra.mxu1 %v3052_v48  ;;  %749 = vmatprep.subr.mxu0 %v2899_v38 }
  0x76   :  { %2501 = vmatmul.mubr.msk.f32.gmra.mxu1 %vm141_vm0, %v2955_v62  ;;  %582 = vmatprep.subr.mxu1 %v3056_v53  ;;  %v3086_v62 = vld [vmem:[#allocation9 + $0x90] sm:$0xff] }
  0x77   :  { %583 = vmatpush1.msra.mxu1 %v3059_v57  ;;  %373 = vmatprep.mubr.f32.mxu1 %v3800_v0  ;;  %3892 = vst [vmem:[#allocation33_spill] sm:$0xff] %v3086_v62 }
  0x78   :  { %584 = vmatprep.subr.mxu1 %v3063_v60  ;;  %750 = vmatpush1.msra.mxu0 %v2902_v40 }
  0x79   :  { %585 = vmatpush1.msra.mxu1 %v3069_v55  ;;  %751 = vmatprep.subr.mxu0 %v2908_v42 }
  0x7a   :  { %2502 = vmatmul.mubr.msk.f32.gmra.mxu1 %vm141_vm0, %v2964_v5  ;;  %586 = vmatprep.subr.mxu1 %v3073_v63  ;;  %v3103_v5 = vld [vmem:[#allocation9 + $0x50] sm:$0xff] }
  0x7b   :  { %587 = vmatpush1.msra.mxu1 %v3076_v1  ;;  %379 = vmatprep.mubr.f32.mxu1 %v3800_v0  ;;  %3896 = vst [vmem:[#allocation37_spill] sm:$0xff] %v3103_v5 }
  0x7c   :  { %588 = vmatprep.subr.mxu1 %v3080_v3  ;;  %752 = vmatpush1.msra.mxu0 %v2911_v44  ;;  %v3110_v44 = vld [vmem:[#allocation9 + $0x30] sm:$0xff] }
  0x7d   :  { %589 = vmatpush1.msra.mxu1 %v3086_v62  ;;  %753 = vmatprep.subr.mxu0 %v2916_v45  ;;  %3898 = vst [vmem:[#allocation39_spill] sm:$0xff] %v3110_v44  ;;  %v3114_v45 = vld [vmem:[#allocation9 + $0x18] sm:$0xff] }
  0x7e   :  { %2503 = vmatmul.mubr.msk.f32.gmra.mxu1 %vm141_vm0, %v2971_v15  ;;  %590 = vmatprep.subr.mxu1 %v3090_v7  ;;  %3899 = vst [vmem:[#allocation40_spill] sm:$0xff] %v3114_v45  ;;  %v3120_v15 = vld [vmem:[#allocation9 + $0x10] sm:$0xff] }
  0x7f   :  { %591 = vmatpush1.msra.mxu1 %v3093_v9  ;;  %385 = vmatprep.mubr.f32.mxu1 %v3800_v0  ;;  %3900 = vst [vmem:[#allocation41_spill] sm:$0xff] %v3120_v15 }
  0x80   :  { %592 = vmatprep.subr.mxu1 %v3097_v11  ;;  %754 = vmatpush1.msra.mxu0 %v2919_v47 }
  0x81   :  { %593 = vmatpush1.msra.mxu1 %v3103_v5  ;;  %755 = vmatprep.subr.mxu0 %v2925_v49 }
  0x82   :  { %2504 = vmatmul.mubr.msk.f32.gmra.mxu1 %vm141_vm0, %v2981_v19  ;;  %594 = vmatprep.subr.mxu1 %v3107_v13 }
  0x83   :  { %595 = vmatpush1.msra.mxu1 %v3110_v44  ;;  %630 = vmatprep.mubr.f32.mxu1 %v3800_v0 }
  0x84   :  { %596 = vmatprep.subr.mxu1 %v3114_v45  ;;  %756 = vmatpush1.msra.mxu0 %v2928_v51 }
  0x85   :  { %597 = vmatpush1.msra.mxu1 %v3120_v15  ;;  %757 = vmatprep.subr.mxu0 %v2933_v52 }
  0x86   :  { %631 = vmatmul.mubr.f32.vlgmr.msra.gmra.mxu1 %v3800_v0  ;;  %802 = vmatprep.subr.mxu1 %v2973_v17 }
  0x87   :  { %803 = vmatpush1.msra.mxu1 %v2992_v21  ;;  %758 = vmatpush1.msra.mxu0 %v2936_v54 }
  0x88   :  { %804 = vmatprep.subr.mxu1 %v2995_v23  ;;  %759 = vmatprep.subr.mxu0 %v2942_v56 }
  0x89   :  { %805 = vmatpush1.msra.mxu1 %v3000_v25  ;;  %760 = vmatpush1.msra.mxu0 %v2945_v58 }
  0x8a   :  { %806 = vmatprep.subr.mxu1 %v3005_v27  ;;  %761 = vmatprep.subr.mxu0 %v2950_v59 }
  0x8b   :  { %807 = vmatpush1.msra.mxu1 %v3008_v29  ;;  %762 = vmatpush1.msra.mxu0 %v2953_v61  ;;  %v119_v61 = vld [vmem:[%s3794_s3] sm:$0xf] }
  0x8c   :  { %808 = vmatprep.subr.mxu1 %v3012_v31  ;;  %866 = vmatprep.mubr.f32.mxu1 %v3800_v0 }
  0x8d   :  { %809 = vmatpush1.msra.mxu1 %v3018_v33  ;;  %968 = vmatprep.subr.mxu0 %v2843_v2  ;;  %v121_v2 = vlaneseq }
  0x8e   :  { %810 = vmatprep.subr.mxu1 %v3022_v34 }
  0x8f   :  { %811 = vmatpush1.msra.mxu1 %v3025_v36  ;;  %v122_v19 = vshrl.u32 %v121_v2, 7 }
  0x90   :  { %812 = vmatprep.subr.mxu1 %v3029_v39 }
  0x91   :  { %813 = vmatpush1.msra.mxu1 %v3035_v41  ;;  %v123_v0 = vsub.s32 0, %v122_v19  ;;  %v127_v58 = vsub.s32 1, %v122_v19 }
  0x92   :  { %814 = vmatprep.subr.mxu1 %v3039_v43 }
  0x93   :  { %815 = vmatpush1.msra.mxu1 %v3042_v46  ;;  %v128_v54 = vrot.slane %v119_v61, %v127_v58 }
  0x94   :  { %816 = vmatprep.subr.mxu1 %v3046_v50 }
  0x95   :  { %817 = vmatpush1.msra.mxu1 %v3052_v48 }
  0x96   :  { %818 = vmatprep.subr.mxu1 %v3056_v53 }
  0x97   :  { %819 = vmatpush1.msra.mxu1 %v3059_v57 }
  0x98   :  { %820 = vmatprep.subr.mxu1 %v3063_v60 }
  0x99   :  { %821 = vmatpush1.msra.mxu1 %v3069_v55 }
  0x9a   :  { %822 = vmatprep.subr.mxu1 %v3073_v63 }
  0x9b   :  { %823 = vmatpush1.msra.mxu1 %v3076_v1 }
  0x9c   :  { %824 = vmatprep.subr.mxu1 %v3080_v3 }
  0x9d   :  { %825 = vmatpush1.msra.mxu1 %v3086_v62 }
  0x9e   :  { %826 = vmatprep.subr.mxu1 %v3090_v7 }
  0x9f   :  { %827 = vmatpush1.msra.mxu1 %v3093_v9 }
  0xa0   :  { %828 = vmatprep.subr.mxu1 %v3097_v11 }
  0xa1   :  { %829 = vmatpush1.msra.mxu1 %v3103_v5  ;;  %v124_v5 = vrot.slane %v119_v61, %v123_v0 }
  0xa2   :  { %830 = vmatprep.subr.mxu1 %v3107_v13 }
  0xa3   :  { %831 = vmatpush1.msra.mxu1 %v3110_v44 }
  0xa4   :  { %832 = vmatprep.subr.mxu1 %v3114_v45 }
  0xa5   :  { %833 = vmatpush1.msra.mxu1 %v3120_v15 }
  0xa6   :  { %1039 = vmatprep.subr.mxu1 %v2973_v17 }
 0x106   :  { %v232_v59 = vpop.f32.mrf.mxu1 }
 0x108   :  { %v234_v56 = vpop.f32.mrf.mxu1 }
 0x10a   :  { %v238_v13 = vpop.f32.mrf.mxu1 }
 0x10b   :  { %v3172_v44 = vadd.f32 %v238_v13, %v124_v5 }
 0x10c   :  { %v240_v45 = vpop.f32.mrf.mxu1 }
 0x10d   :  { %3901 = vst [vmem:[#allocation42_spill] sm:$0xff] %v3172_v44  ;;  %v3174_v11 = vadd.f32 %v240_v45, %v128_v54  ;;  %v135_v44 = vsub.s32 3, %v122_v19 }
 0x10e   :  { %v244_v15 = vpop.f32.mrf.mxu1 }
 0x10f   :  { %3902 = vst [vmem:[#allocation43_spill] sm:$0xff] %v3174_v11  ;;  %v3176_v17 = vadd.f32 %v244_v15, %v124_v5 }
 0x110   :  { %v246_v2 = vpop.f32.mrf.mxu1 }
 0x111   :  { %3903 = vst [vmem:[#allocation44_spill] sm:$0xff] %v3176_v17  ;;  %v3178_v52 = vadd.f32 %v246_v2, %v128_v54 }
 0x112   :  { %v250_v9 = vpop.f32.mrf.mxu1 }
 0x113   :  { %3904 = vst [vmem:[#allocation45_spill] sm:$0xff] %v3178_v52  ;;  %v3180_v51 = vadd.f32 %v250_v9, %v124_v5 }
 0x114   :  { %v252_v7 = vpop.f32.mrf.mxu1 }
 0x115   :  { %3905 = vst [vmem:[#allocation46_spill] sm:$0xff] %v3180_v51  ;;  %v3182_v49 = vadd.f32 %v252_v7, %v128_v54 }
 0x116   :  { %v256_v0 = vpop.f32.mrf.mxu1 }
 0x117   :  { %3906 = vst [vmem:[#allocation47_spill] sm:$0xff] %v3182_v49  ;;  %v3184_v62 = vadd.f32 %v256_v0, %v124_v5 }
 0x118   :  { %v258_v58 = vpop.f32.mrf.mxu1 }
 0x119   :  { %3907 = vst [vmem:[#allocation48_spill] sm:$0xff] %v3184_v62  ;;  %v3186_v13 = vadd.f32 %v258_v58, %v128_v54  ;;  %v131_v58 = vsub.s32 2, %v122_v19 }
 0x11a   :  { %v262_v45 = vpop.f32.mrf.mxu1 }
 0x11b   :  { %3908 = vst [vmem:[#allocation49_spill] sm:$0xff] %v3186_v13  ;;  %v3188_v11 = vadd.f32 %v262_v45, %v124_v5 }
 0x11c   :  { %v264_v15 = vpop.f32.mrf.mxu1 }
 0x11d   :  { %3909 = vst [vmem:[#allocation50_spill] sm:$0xff] %v3188_v11  ;;  %v3190_v17 = vadd.f32 %v264_v15, %v128_v54  ;;  %v132_v11 = vrot.slane %v119_v61, %v131_v58  ;;  %v136_v15 = vrot.slane %v119_v61, %v135_v44  ;;  %v235_v61 = vadd.f32 %v234_v56, %v128_v54 }
 0x11e   :  { %v268_v2 = vpop.f32.mrf.mxu1 }
 0x11f   :  { %3910 = vst [vmem:[#allocation51_spill] sm:$0xff] %v3190_v17  ;;  %v3192_v52 = vadd.f32 %v268_v2, %v124_v5 }
 0x120   :  { %v270_v9 = vpop.f32.mrf.mxu1 }
 0x121   :  { %3911 = vst [vmem:[#allocation52_spill] sm:$0xff] %v3192_v52  ;;  %v3194_v51 = vadd.f32 %v270_v9, %v128_v54 }
 0x122   :  { %v274_v7 = vpop.f32.mrf.mxu1 }
 0x123   :  { %3912 = vst [vmem:[#allocation53_spill] sm:$0xff] %v3194_v51  ;;  %v3196_v49 = vadd.f32 %v274_v7, %v124_v5 }
 0x124   :  { %v276_v0 = vpop.f32.mrf.mxu1 }
 0x125   :  { %3913 = vst [vmem:[#allocation54_spill] sm:$0xff] %v3196_v49  ;;  %v3198_v62 = vadd.f32 %v276_v0, %v128_v54 }
 0x126   :  { %v345_v13 = vpop.f32.mrf.mxu1 }
 0x127   :  { %3914 = vst [vmem:[#allocation55_spill] sm:$0xff] %v3198_v62  ;;  %v561_v62 = vpop.f32.mrf.mxu0 }
 0x128   :  { %v347_v45 = vpop.f32.mrf.mxu1 }
 0x129   :  { %v563_v44 = vpop.f32.mrf.mxu0 }
 0x12a   :  { %v351_v47 = vpop.f32.mrf.mxu1 }
 0x12b   :  { %v3200_v17 = vadd.f32 %v351_v47, %v132_v11 }
 0x12c   :  { %v353_v2 = vpop.f32.mrf.mxu1 }
 0x12d   :  { %3915 = vst [vmem:[#allocation56_spill] sm:$0xff] %v3200_v17  ;;  %v3202_v52 = vadd.f32 %v353_v2, %v136_v15 }
 0x12e   :  { %v357_v9 = vpop.f32.mrf.mxu1 }
 0x12f   :  { %3916 = vst [vmem:[#allocation57_spill] sm:$0xff] %v3202_v52  ;;  %v3204_v51 = vadd.f32 %v357_v9, %v132_v11  ;;  %v233_v9 = vadd.f32 %v232_v59, %v124_v5  ;;  %v348_v5 = vadd.f32 %v347_v45, %v136_v15 }
 0x130   :  { %v359_v7 = vpop.f32.mrf.mxu1 }
 0x131   :  { %3917 = vst [vmem:[#allocation58_spill] sm:$0xff] %v3204_v51  ;;  %v3206_v49 = vadd.f32 %v359_v7, %v136_v15  ;;  %v638_v51 = vadd.f32 %v563_v44, %v235_v61 }
 0x132   :  { %v363_v0 = vpop.f32.mrf.mxu1 }
 0x133   :  { %3918 = vst [vmem:[#allocation59_spill] sm:$0xff] %v3206_v49  ;;  %v3208_v3 = vadd.f32 %v363_v0, %v132_v11  ;;  %v637_v49 = vadd.f32 %v561_v62, %v233_v9 }
 0x134   :  { %v365_v19 = vpop.f32.mrf.mxu1 }
 0x135   :  { %3919 = vst [vmem:[#allocation60_spill] sm:$0xff] %v3208_v3  ;;  %v3210_v1 = vadd.f32 %v365_v19, %v136_v15  ;;  %v642_v3 = vmul.f32 0.5, %v638_v51  ;;  %v641_v42 = vmul.f32 0.5, %v637_v49  ;;  %v346_v51 = vadd.f32 %v345_v13, %v132_v11 }
 0x136   :  { %v369_v58 = vpop.f32.mrf.mxu1 }
 0x137   :  { %3920 = vst [vmem:[#allocation61_spill] sm:$0xff] %v3210_v1  ;;  %v3212_v47 = vadd.f32 %v369_v58, %v132_v11  ;;  %2584 = vtanh.f32 %v642_v3 }
 0x138   :  { %v371_v2 = vpop.f32.mrf.mxu1  ;;  %2586 = vtanh.f32 %v641_v42 }
 0x139   :  { %3921 = vst [vmem:[#allocation62_spill] sm:$0xff] %v3212_v47  ;;  %v3214_v17 = vadd.f32 %v371_v2, %v136_v15 }
 0x13a   :  { %v375_v52 = vpop.f32.mrf.mxu1 }
 0x13b   :  { %3922 = vst [vmem:[#allocation63_spill] sm:$0xff] %v3214_v17  ;;  %v3216_v7 = vadd.f32 %v375_v52, %v132_v11  ;;  %v3984_v17 = vld [vmem:[#allocation45_spill] sm:$0xff] }
 0x13c   :  { %v377_v63 = vpop.f32.mrf.mxu1 }
 0x13d   :  { %3923 = vst [vmem:[#allocation64_spill] sm:$0xff] %v3216_v7  ;;  %v3218_v0 = vadd.f32 %v377_v63, %v136_v15 }
 0x13e   :  { %v381_v19 = vpop.f32.mrf.mxu1 }
 0x13f   :  { %3924 = vst [vmem:[#allocation65_spill] sm:$0xff] %v3218_v0  ;;  %v3220_v1 = vadd.f32 %v381_v19, %v132_v11 }
 0x140   :  { %v383_v58 = vpop.f32.mrf.mxu1 }
 0x141   :  { %3925 = vst [vmem:[#allocation66_spill] sm:$0xff] %v3220_v1  ;;  %v3222_v47 = vadd.f32 %v383_v58, %v136_v15 }
 0x142   :  { %v387_v54 = vpop.f32.mrf.mxu1 }
 0x143   :  { %3926 = vst [vmem:[#allocation67_spill] sm:$0xff] %v3222_v47  ;;  %v3224_v56 = vadd.f32 %v387_v54, %v132_v11 }
 0x144   :  { %v389_v59 = vpop.f32.mrf.mxu1  ;;  %v2585_v2 = vpop.eup %2584 }
 0x145   :  { %3927 = vst [vmem:[#allocation68_spill] sm:$0xff] %v3224_v56  ;;  %v3226_v52 = vadd.f32 %v389_v59, %v136_v15  ;;  %v2587_v49 = vpop.eup %2586  ;;  %v648_v9 = vadd.f32 1.0, %v2585_v2  ;;  %v3958_v2 = vld [vmem:[#allocation57_spill] sm:$0xff] }
 0x146   :  { %v632_v62 = vpop.f32.mrf.mxu1  ;;  %v647_v58 = vadd.f32 1.0, %v2587_v49 }
 0x147   :  { %3928 = vst [vmem:[#allocation69_spill] sm:$0xff] %v3226_v52  ;;  %v639_v61 = vadd.f32 %v632_v62, %v346_v51  ;;  %v651_v3 = vmul.f32 0.5, %v648_v9  ;;  %v3959_v9 = vld [vmem:[#allocation56_spill] sm:$0xff] }
 0x148   :  { %v634_v63 = vpop.f32.mrf.mxu1  ;;  %v650_v54 = vmul.f32 0.5, %v647_v58 }
 0x149   :  { %v640_v44 = vadd.f32 %v634_v63, %v348_v5  ;;  %v643_v19 = vmul.f32 0.5, %v639_v61  ;;  %v654_v42 = vmul.f32 0.0, %v651_v3 }
 0x14b   :  { %2588 = vtanh.f32 %v640_v44  ;;  %v3957_v44 = vld [vmem:[#allocation43_spill] sm:$0xff] }
 0x14c   :  { %2590 = vtanh.f32 %v643_v19 }
 0x158   :  { %v2589_v56 = vpop.eup %2588 }
 0x159   :  { %v655_v1 = vmul.f32 %v2589_v56, %v650_v54  ;;  %v2591_v45 = vpop.eup %2590 }
 0x15a   :  { %v649_v15 = vadd.f32 1.0, %v2591_v45 }
 0x15b   :  { %v3228_v59 = vadd.f32 %v655_v1, %v654_v42 }
 0x15c   :  { %v652_v11 = vmul.f32 0.5, %v649_v15 }
 0x15d   :  { %2592 = vtanh.f32 %v3228_v59 }
 0x16a   :  { %v2593_v13 = vpop.eup %2592 }
 0x16b   :  { %v3231_v62 = vmul.f32 %v2593_v13, %v652_v11 }
 0x16d   :  { %3929 = vst [vmem:[#allocation70_spill] sm:$0xff] %v3231_v62  ;;  %796 = vmatmul.mubr.f32.vlgmr.msra.gmra.mxu0 %v3231_v62  ;;  %867 = vmatmul.mubr.f32.vlgmr.msra.gmra.mxu1 %v3231_v62 }
 0x16e   :  { %969 = vmatpush1.msra.mxu0 %v2846_v4  ;;  %1040 = vmatpush1.msra.mxu1 %v2992_v21  ;;  %v3930_v4 = vld [vmem:[#allocation17_spill] sm:$0xff] }
 0x16f   :  { %970 = vmatprep.subr.mxu0 %v2848_v6  ;;  %1041 = vmatprep.subr.mxu1 %v2995_v23  ;;  %v3931_v6 = vld [vmem:[#allocation30_spill] sm:$0xff] }
 0x170   :  { %971 = vmatpush1.msra.mxu0 %v2851_v8  ;;  %1042 = vmatpush1.msra.mxu1 %v3000_v25  ;;  %v3932_v8 = vld [vmem:[#allocation18_spill] sm:$0xff] }
 0x171   :  { %972 = vmatprep.subr.mxu0 %v2854_v10  ;;  %1043 = vmatprep.subr.mxu1 %v3005_v27  ;;  %v3933_v10 = vld [vmem:[#allocation31_spill] sm:$0xff] }
 0x172   :  { %973 = vmatpush1.msra.mxu0 %v2856_v12  ;;  %1044 = vmatpush1.msra.mxu1 %v3008_v29  ;;  %v3934_v12 = vld [vmem:[#allocation19_spill] sm:$0xff] }
 0x173   :  { %974 = vmatprep.subr.mxu0 %v2859_v14  ;;  %1045 = vmatprep.subr.mxu1 %v3012_v31  ;;  %v3935_v14 = vld [vmem:[#allocation32_spill] sm:$0xff] }
 0x174   :  { %975 = vmatpush1.msra.mxu0 %v2862_v16  ;;  %1046 = vmatpush1.msra.mxu1 %v3018_v33  ;;  %v3936_v16 = vld [vmem:[#allocation20_spill] sm:$0xff] }
 0x175   :  { %976 = vmatprep.subr.mxu0 %v2865_v18  ;;  %1047 = vmatprep.subr.mxu1 %v3022_v34  ;;  %v3937_v18 = vld [vmem:[#allocation33_spill] sm:$0xff] }
 0x176   :  { %977 = vmatpush1.msra.mxu0 %v2868_v20  ;;  %1048 = vmatpush1.msra.mxu1 %v3025_v36  ;;  %v3938_v20 = vld [vmem:[#allocation21_spill] sm:$0xff] }
 0x177   :  { %978 = vmatprep.subr.mxu0 %v2871_v22  ;;  %1049 = vmatprep.subr.mxu1 %v3029_v39  ;;  %v3939_v22 = vld [vmem:[#allocation34_spill] sm:$0xff]  ;;  %v3949_v39 = vld [vmem:[#allocation39_spill] sm:$0xff] }
 0x178   :  { %979 = vmatpush1.msra.mxu0 %v2874_v24  ;;  %1050 = vmatpush1.msra.mxu1 %v3035_v41  ;;  %v3940_v24 = vld [vmem:[#allocation22_spill] sm:$0xff]  ;;  %v3950_v41 = vld [vmem:[#allocation27_spill] sm:$0xff] }
 0x179   :  { %980 = vmatprep.subr.mxu0 %v2877_v26  ;;  %1051 = vmatprep.subr.mxu1 %v3039_v43  ;;  %v3941_v26 = vld [vmem:[#allocation35_spill] sm:$0xff]  ;;  %v3951_v43 = vld [vmem:[#allocation40_spill] sm:$0xff] }
 0x17a   :  { %981 = vmatpush1.msra.mxu0 %v2880_v28  ;;  %1052 = vmatpush1.msra.mxu1 %v3042_v46  ;;  %v3942_v28 = vld [vmem:[#allocation23_spill] sm:$0xff]  ;;  %v3952_v46 = vld [vmem:[#allocation28_spill] sm:$0xff] }
 0x17b   :  { %982 = vmatprep.subr.mxu0 %v2883_v30  ;;  %1053 = vmatprep.subr.mxu1 %v3046_v50  ;;  %v3943_v30 = vld [vmem:[#allocation36_spill] sm:$0xff]  ;;  %v3953_v50 = vmov 0.0  }
 0x17c   :  { %983 = vmatpush1.msra.mxu0 %v2886_v32  ;;  %1054 = vmatpush1.msra.mxu1 %v3052_v48  ;;  %v3944_v32 = vld [vmem:[#allocation24_spill] sm:$0xff]  ;;  %v3954_v48 = vld [vmem:[#allocation41_spill] sm:$0xff] }
 0x17d   :  { %984 = vmatprep.subr.mxu0 %v2892_v35  ;;  %1055 = vmatprep.subr.mxu1 %v3056_v53  ;;  %v3945_v35 = vld [vmem:[#allocation37_spill] sm:$0xff] }
 0x17e   :  { %985 = vmatpush1.msra.mxu0 %v2895_v37  ;;  %1056 = vmatpush1.msra.mxu1 %v3059_v57  ;;  %v3946_v37 = vld [vmem:[#allocation25_spill] sm:$0xff] }
 0x17f   :  { %986 = vmatprep.subr.mxu0 %v2899_v38  ;;  %1057 = vmatprep.subr.mxu1 %v3063_v60  ;;  %v3947_v38 = vld [vmem:[#allocation38_spill] sm:$0xff]  ;;  %v3955_v53 = vld [vmem:[#allocation29_spill] sm:$0xff] }
 0x180   :  { %987 = vmatpush1.msra.mxu0 %v2902_v40  ;;  %1058 = vmatpush1.msra.mxu1 %v3069_v55  ;;  %v3948_v40 = vld [vmem:[#allocation26_spill] sm:$0xff] }
 0x181   :  { %988 = vmatprep.subr.mxu0 %v3930_v4  ;;  %1059 = vmatprep.subr.mxu1 %v3931_v6  ;;  %v3956_v55 = vld [vmem:[#allocation42_spill] sm:$0xff] }
 0x182   :  { %989 = vmatpush1.msra.mxu0 %v3932_v8  ;;  %1060 = vmatpush1.msra.mxu1 %v3933_v10 }
 0x183   :  { %990 = vmatprep.subr.mxu0 %v3934_v12  ;;  %1061 = vmatprep.subr.mxu1 %v3935_v14 }
 0x184   :  { %991 = vmatpush1.msra.mxu0 %v3936_v16  ;;  %1062 = vmatpush1.msra.mxu1 %v3937_v18 }
 0x185   :  { %992 = vmatprep.subr.mxu0 %v3938_v20  ;;  %1063 = vmatprep.subr.mxu1 %v3939_v22  ;;  %v3353_v20 = vld [vmem:[#allocation9 + $0x148] sm:$0xff]  ;;  %v3355_v22 = vld [vmem:[#allocation9 + $0x158] sm:$0xff] }
 0x186   :  { %993 = vmatpush1.msra.mxu0 %v3940_v24  ;;  %1064 = vmatpush1.msra.mxu1 %v3941_v26  ;;  %v3359_v24 = vld [vmem:[#allocation9 + $0x140] sm:$0xff]  ;;  %v3361_v26 = vld [vmem:[#allocation9 + $0x150] sm:$0xff] }
 0x187   :  { %994 = vmatprep.subr.mxu0 %v3942_v28  ;;  %1065 = vmatprep.subr.mxu1 %v3943_v30  ;;  %v3365_v28 = vld [vmem:[#allocation9 + $0x128] sm:$0xff]  ;;  %v3367_v30 = vld [vmem:[#allocation9 + $0x138] sm:$0xff] }
 0x188   :  { %995 = vmatpush1.msra.mxu0 %v3944_v32  ;;  %1066 = vmatpush1.msra.mxu1 %v3945_v35  ;;  %v3371_v32 = vld [vmem:[#allocation9 + $0x120] sm:$0xff]  ;;  %v3373_v35 = vld [vmem:[#allocation9 + $0x130] sm:$0xff] }
 0x189   :  { %996 = vmatprep.subr.mxu0 %v3946_v37  ;;  %1067 = vmatprep.subr.mxu1 %v3947_v38  ;;  %v3377_v37 = vld [vmem:[#allocation9 + $0x108] sm:$0xff]  ;;  %v3379_v38 = vld [vmem:[#allocation9 + $0x118] sm:$0xff] }
 0x18a   :  { %997 = vmatpush1.msra.mxu0 %v3948_v40  ;;  %1068 = vmatpush1.msra.mxu1 %v3949_v39  ;;  %v3381_v40 = vld [vmem:[#allocation9 + $0x100] sm:$0xff]  ;;  %v3385_v39 = vld [vmem:[#allocation9 + $0x110] sm:$0xff] }
 0x18b   :  { %998 = vmatprep.subr.mxu0 %v3950_v41  ;;  %1069 = vmatprep.subr.mxu1 %v3951_v43  ;;  %v3387_v41 = vld [vmem:[#allocation9 + $0xe8] sm:$0xff]  ;;  %v3389_v43 = vld [vmem:[#allocation9 + $0xf8] sm:$0xff] }
 0x18c   :  { %999 = vmatpush1.msra.mxu0 %v3952_v46  ;;  %1032 = vmatprep.mubr.f32.mxu0 %v3953_v50  ;;  %v3393_v46 = vld [vmem:[#allocation9 + $0xe0] sm:$0xff] }
 0x18d   :  { %1070 = vmatpush1.msra.mxu1 %v3954_v48  ;;  %1103 = vmatprep.mubr.f32.mxu1 %v3953_v50  ;;  %v3395_v48 = vld [vmem:[#allocation9 + $0xf0] sm:$0xff] }
 0x18e   :  { %1276 = vmatprep.subr.mxu1 %v3955_v53  ;;  %v3397_v53 = vld [vmem:[#allocation9 + $0xc8] sm:$0xff] }
 0x22d   :  { %v797_v57 = vpop.f32.mrf.mxu0  ;;  %v868_v60 = vpop.f32.mrf.mxu1 }
 0x22e   :  { %v873_v1 = vadd.f32 %v797_v57, %v3956_v55  ;;  %v875_v19 = vadd.f32 %v868_v60, %v3959_v9  ;;  %v3401_v57 = vld [vmem:[#allocation9 + $0xd8] sm:$0xff]  ;;  %v3403_v60 = vld [vmem:[#allocation9 + $0xc0] sm:$0xff]  ;;  %v3405_v55 = vld [vmem:[#allocation9 + $0xd0] sm:$0xff] }
 0x22f   :  { %v799_v56 = vpop.f32.mrf.mxu0  ;;  %v870_v5 = vpop.f32.mrf.mxu1  ;;  %v3435_v9 = vld [vmem:[#allocation9 + $0x78] sm:$0xff] }
 0x230   :  { %v877_v63 = vmul.f32 0.5, %v873_v1  ;;  %v874_v51 = vadd.f32 %v799_v56, %v3957_v44  ;;  %v876_v49 = vadd.f32 %v870_v5, %v3958_v2  ;;  %v879_v58 = vmul.f32 0.5, %v875_v19  ;;  %v3409_v1 = vld [vmem:[#allocation9 + $0xa8] sm:$0xff]  ;;  %v3411_v56 = vld [vmem:[#allocation9 + $0xb8] sm:$0xff]  ;;  %v3415_v5 = vld [vmem:[#allocation9 + $0xa0] sm:$0xff]  ;;  %3968 = vst [vmem:[#allocation21_spill] sm:$0xff] %v3435_v9 }
 0x231   :  { %3962 = vst [vmem:[#allocation18_spill] sm:$0xff] %v3411_v56  ;;  %v3421_v44 = vld [vmem:[#allocation9 + $0x88] sm:$0xff]  ;;  %v3429_v2 = vld [vmem:[#allocation9 + $0x90] sm:$0xff]  ;;  %v3439_v19 = vld [vmem:[#allocation9 + $0x60] sm:$0xff] }
 0x232   :  { %2594 = vtanh.f32 %v877_v63  ;;  %v878_v61 = vmul.f32 0.5, %v874_v51  ;;  %v3417_v63 = vld [vmem:[#allocation9 + $0xb0] sm:$0xff]  ;;  %v3423_v51 = vld [vmem:[#allocation9 + $0x98] sm:$0xff]  ;;  %3966 = vst [vmem:[#allocation20_spill] sm:$0xff] %v3429_v2  ;;  %3969 = vst [vmem:[#allocation34_spill] sm:$0xff] %v3439_v19 }
 0x233   :  { %3963 = vst [vmem:[#allocation31_spill] sm:$0xff] %v3417_v63  ;;  %3964 = vst [vmem:[#allocation19_spill] sm:$0xff] %v3423_v51 }
 0x234   :  { %2596 = vtanh.f32 %v878_v61  ;;  %v3427_v61 = vld [vmem:[#allocation9 + $0x80] sm:$0xff] }
 0x235   :  { %2598 = vtanh.f32 %v876_v49  ;;  %3965 = vst [vmem:[#allocation32_spill] sm:$0xff] %v3427_v61  ;;  %v3433_v49 = vld [vmem:[#allocation9 + $0x68] sm:$0xff] }
 0x236   :  { %2600 = vtanh.f32 %v879_v58  ;;  %3967 = vst [vmem:[#allocation33_spill] sm:$0xff] %v3433_v49  ;;  %v3441_v58 = vld [vmem:[#allocation9 + $0x70] sm:$0xff] }
 0x237   :  { %3970 = vst [vmem:[#allocation22_spill] sm:$0xff] %v3441_v58 }
 0x23f   :  { %v2595_v3 = vpop.eup %2594 }
 0x240   :  { %v883_v54 = vadd.f32 1.0, %v2595_v3  ;;  %v3445_v3 = vld [vmem:[#allocation9 + $0x48] sm:$0xff] }
 0x241   :  { %v2597_v42 = vpop.eup %2596  ;;  %3971 = vst [vmem:[#allocation35_spill] sm:$0xff] %v3445_v3 }
 0x242   :  { %v886_v45 = vmul.f32 0.5, %v883_v54  ;;  %v884_v15 = vadd.f32 1.0, %v2597_v42  ;;  %v2599_v11 = vpop.eup %2598  ;;  %v3447_v54 = vld [vmem:[#allocation9 + $0x58] sm:$0xff]  ;;  %v3451_v42 = vld [vmem:[#allocation9 + $0x40] sm:$0xff] }
 0x243   :  { %v2601_v10 = vpop.eup %2600  ;;  %3972 = vst [vmem:[#allocation23_spill] sm:$0xff] %v3447_v54  ;;  %3973 = vst [vmem:[#allocation36_spill] sm:$0xff] %v3451_v42 }
 0x244   :  { %v887_v13 = vmul.f32 0.5, %v884_v15  ;;  %v891_v4 = vmul.f32 %v2599_v11, %v886_v45  ;;  %v885_v12 = vadd.f32 1.0, %v2601_v10  ;;  %v3453_v45 = vld [vmem:[#allocation9 + $0x50] sm:$0xff]  ;;  %v3457_v15 = vld [vmem:[#allocation9 + $0x28] sm:$0xff]  ;;  %v3459_v11 = vld [vmem:[#allocation9 + $0x38] sm:$0xff] }
 0x245   :  { %3974 = vst [vmem:[#allocation24_spill] sm:$0xff] %v3453_v45  ;;  %3975 = vst [vmem:[#allocation37_spill] sm:$0xff] %v3457_v15  ;;  %v3471_v10 = vld [vmem:[#allocation9 + $0x18] sm:$0xff] }
 0x246   :  { %v890_v6 = vmul.f32 %v887_v13, %v3228_v59  ;;  %v888_v14 = vmul.f32 0.5, %v885_v12  ;;  %v3350_v59 = vld [vmem:[#allocation9 + $0x160] sm:$0xff]  ;;  %3976 = vst [vmem:[#allocation25_spill] sm:$0xff] %v3459_v11  ;;  %3980 = vst [vmem:[#allocation27_spill] sm:$0xff] %v3471_v10 }
 0x247   :  { %v3463_v13 = vld [vmem:[#allocation9 + $0x20] sm:$0xff] }
 0x248   :  { %v3305_v8 = vadd.f32 %v891_v4, %v890_v6  ;;  %3977 = vst [vmem:[#allocation38_spill] sm:$0xff] %v3463_v13  ;;  %v3465_v4 = vld [vmem:[#allocation9 + $0x30] sm:$0xff]  ;;  %v3469_v6 = vld [vmem:[#allocation9 + $0x8] sm:$0xff]  ;;  %v3475_v12 = vld [vmem:[#allocation9] sm:$0xff] }
 0x249   :  { %3978 = vst [vmem:[#allocation26_spill] sm:$0xff] %v3465_v4  ;;  %3979 = vst [vmem:[#allocation39_spill] sm:$0xff] %v3469_v6 }
 0x24a   :  { %2602 = vtanh.f32 %v3305_v8  ;;  %3981 = vst [vmem:[#allocation40_spill] sm:$0xff] %v3475_v12 }
 0x257   :  { %v2603_v16 = vpop.eup %2602 }
 0x258   :  { %v3308_v18 = vmul.f32 %v2603_v16, %v888_v14  ;;  %v3477_v14 = vld [vmem:[#allocation9 + $0x10] sm:$0xff] }
 0x259   :  { %3982 = vst [vmem:[#allocation28_spill] sm:$0xff] %v3477_v14 }
 0x25a   :  { %3960 = vst [vmem:[#allocation17_spill] sm:$0xff] %v3308_v18  ;;  %1033 = vmatmul.mubr.f32.vlgmr.msra.gmra.mxu0 %v3308_v18  ;;  %1104 = vmatmul.mubr.f32.vlgmr.msra.gmra.mxu1 %v3308_v18  ;;  %v3983_v18 = vld [vmem:[#allocation44_spill] sm:$0xff] }
 0x25b   :  { %1277 = vmatpush1.msra.mxu1 %v2992_v21  ;;  %1269 = vmatprep.mubr.f32.mxu0 %v3953_v50  ;;  %v3323_v21 = vld [vmem:[#allocation9 + $0x1e8] sm:$0xff] }
 0x25c   :  { %1278 = vmatprep.subr.mxu1 %v2995_v23  ;;  %1340 = vmatprep.mubr.f32.mxu1 %v3953_v50  ;;  %3961 = vst [vmem:[#allocation30_spill] sm:$0xff] %v3323_v21  ;;  %v3326_v23 = vld [vmem:[#allocation9 + $0x1e0] sm:$0xff] }
 0x25d   :  { %1279 = vmatpush1.msra.mxu1 %v3000_v25  ;;  %1205 = vmatprep.subr.mxu0 %v3323_v21  ;;  %v3329_v25 = vld [vmem:[#allocation9 + $0x1c8] sm:$0xff] }
 0x25e   :  { %1280 = vmatprep.subr.mxu1 %v3005_v27  ;;  %1206 = vmatpush1.msra.mxu0 %v3326_v23  ;;  %v3332_v27 = vld [vmem:[#allocation9 + $0x1c0] sm:$0xff] }
 0x25f   :  { %1281 = vmatpush1.msra.mxu1 %v3008_v29  ;;  %1207 = vmatprep.subr.mxu0 %v3329_v25  ;;  %v3335_v29 = vld [vmem:[#allocation9 + $0x1a8] sm:$0xff] }
 0x260   :  { %1282 = vmatprep.subr.mxu1 %v3012_v31  ;;  %1208 = vmatpush1.msra.mxu0 %v3332_v27  ;;  %v3338_v31 = vld [vmem:[#allocation9 + $0x1a0] sm:$0xff] }
 0x261   :  { %1283 = vmatpush1.msra.mxu1 %v3018_v33  ;;  %1209 = vmatprep.subr.mxu0 %v3335_v29  ;;  %v3341_v33 = vld [vmem:[#allocation9 + $0x188] sm:$0xff] }
 0x262   :  { %1284 = vmatprep.subr.mxu1 %v3022_v34  ;;  %1210 = vmatpush1.msra.mxu0 %v3338_v31  ;;  %v3344_v34 = vld [vmem:[#allocation9 + $0x180] sm:$0xff] }
 0x263   :  { %1285 = vmatpush1.msra.mxu1 %v3025_v36  ;;  %1211 = vmatprep.subr.mxu0 %v3341_v33  ;;  %v3347_v36 = vld [vmem:[#allocation9 + $0x168] sm:$0xff] }
 0x264   :  { %1212 = vmatpush1.msra.mxu0 %v3344_v34  ;;  %1286 = vmatprep.subr.mxu1 %v3355_v22 }
 0x265   :  { %1213 = vmatprep.subr.mxu0 %v3347_v36  ;;  %1287 = vmatpush1.msra.mxu1 %v3361_v26 }
 0x266   :  { %1214 = vmatpush1.msra.mxu0 %v3350_v59  ;;  %1288 = vmatprep.subr.mxu1 %v3367_v30 }
 0x267   :  { %1215 = vmatprep.subr.mxu0 %v3353_v20  ;;  %1289 = vmatpush1.msra.mxu1 %v3373_v35 }
 0x268   :  { %1216 = vmatpush1.msra.mxu0 %v3359_v24  ;;  %1290 = vmatprep.subr.mxu1 %v3379_v38 }
 0x269   :  { %1217 = vmatprep.subr.mxu0 %v3365_v28  ;;  %1291 = vmatpush1.msra.mxu1 %v3385_v39 }
 0x26a   :  { %1218 = vmatpush1.msra.mxu0 %v3371_v32  ;;  %1292 = vmatprep.subr.mxu1 %v3389_v43 }
 0x26b   :  { %1219 = vmatprep.subr.mxu0 %v3377_v37  ;;  %1293 = vmatpush1.msra.mxu1 %v3395_v48 }
 0x26c   :  { %1220 = vmatpush1.msra.mxu0 %v3381_v40  ;;  %1294 = vmatprep.subr.mxu1 %v3401_v57 }
 0x26d   :  { %1221 = vmatprep.subr.mxu0 %v3387_v41  ;;  %1295 = vmatpush1.msra.mxu1 %v3405_v55 }
 0x26e   :  { %1222 = vmatpush1.msra.mxu0 %v3393_v46  ;;  %1296 = vmatprep.subr.mxu1 %v3411_v56 }
 0x26f   :  { %1223 = vmatprep.subr.mxu0 %v3397_v53  ;;  %1297 = vmatpush1.msra.mxu1 %v3417_v63 }
 0x270   :  { %1224 = vmatpush1.msra.mxu0 %v3403_v60  ;;  %1298 = vmatprep.subr.mxu1 %v3423_v51 }
 0x271   :  { %1225 = vmatprep.subr.mxu0 %v3409_v1  ;;  %1299 = vmatpush1.msra.mxu1 %v3429_v2 }
 0x272   :  { %1226 = vmatpush1.msra.mxu0 %v3415_v5  ;;  %1300 = vmatprep.subr.mxu1 %v3435_v9 }
 0x273   :  { %1227 = vmatprep.subr.mxu0 %v3421_v44  ;;  %1301 = vmatpush1.msra.mxu1 %v3441_v58 }
 0x274   :  { %1228 = vmatpush1.msra.mxu0 %v3427_v61  ;;  %1302 = vmatprep.subr.mxu1 %v3447_v54 }
 0x275   :  { %1229 = vmatprep.subr.mxu0 %v3433_v49  ;;  %1303 = vmatpush1.msra.mxu1 %v3453_v45  ;;  %v3985_v45 = vld [vmem:[#allocation59_spill] sm:$0xff] }
 0x276   :  { %1230 = vmatpush1.msra.mxu0 %v3439_v19  ;;  %1304 = vmatprep.subr.mxu1 %v3459_v11 }
 0x277   :  { %1231 = vmatprep.subr.mxu0 %v3445_v3  ;;  %1305 = vmatpush1.msra.mxu1 %v3465_v4 }
 0x278   :  { %1232 = vmatpush1.msra.mxu0 %v3451_v42  ;;  %1306 = vmatprep.subr.mxu1 %v3471_v10  ;;  %v3986_v10 = vld [vmem:[#allocation58_spill] sm:$0xff] }
 0x279   :  { %1233 = vmatprep.subr.mxu0 %v3457_v15  ;;  %1307 = vmatpush1.msra.mxu1 %v3477_v14 }
 0x27a   :  { %1234 = vmatpush1.msra.mxu0 %v3463_v13 }
 0x27b   :  { %1235 = vmatprep.subr.mxu0 %v3469_v6 }
 0x27c   :  { %1236 = vmatpush1.msra.mxu0 %v3475_v12 }
 0x27d   :  { %1442 = vmatprep.subr.mxu0 %v3323_v21 }
 0x31a   :  { %v1034_v16 = vpop.f32.mrf.mxu0  ;;  %v1105_v52 = vpop.f32.mrf.mxu1 }
 0x31b   :  { %v1110_v62 = vadd.f32 %v1034_v16, %v3983_v18  ;;  %v1112_v58 = vadd.f32 %v1105_v52, %v3986_v10  ;;  %v3559_v10 = vld [vmem:[#allocation9 + $0x170] sm:$0xff] }
 0x31c   :  { %v1036_v47 = vpop.f32.mrf.mxu0  ;;  %v1107_v7 = vpop.f32.mrf.mxu1 }
 0x31d   :  { %v1114_v0 = vmul.f32 0.5, %v1110_v62  ;;  %v1111_v11 = vadd.f32 %v1036_v47, %v3984_v17  ;;  %v1113_v54 = vadd.f32 %v1107_v7, %v3985_v45  ;;  %v1116_v14 = vmul.f32 0.5, %v1112_v58  ;;  %v3550_v45 = vld [vmem:[#allocation9 + $0x198] sm:$0xff] }
 0x31f   :  { %2604 = vtanh.f32 %v1114_v0  ;;  %v1115_v4 = vmul.f32 0.5, %v1111_v11  ;;  %v3553_v11 = vld [vmem:[#allocation9 + $0x190] sm:$0xff] }
 0x321   :  { %2606 = vtanh.f32 %v1115_v4  ;;  %v3556_v4 = vld [vmem:[#allocation9 + $0x178] sm:$0xff] }
 0x322   :  { %2608 = vtanh.f32 %v1113_v54 }
 0x323   :  { %2610 = vtanh.f32 %v1116_v14  ;;  %v3989_v14 = vld [vmem:[#allocation18_spill] sm:$0xff] }
 0x32c   :  { %v2605_v9 = vpop.eup %2604 }
 0x32d   :  { %v1120_v2 = vadd.f32 1.0, %v2605_v9  ;;  %v3547_v9 = vld [vmem:[#allocation9 + $0x1b0] sm:$0xff] }
 0x32e   :  { %v2607_v51 = vpop.eup %2606 }
 0x32f   :  { %v1123_v63 = vmul.f32 0.5, %v1120_v2  ;;  %v1121_v18 = vadd.f32 1.0, %v2607_v51  ;;  %v2609_v16 = vpop.eup %2608  ;;  %v3541_v51 = vld [vmem:[#allocation9 + $0x1d0] sm:$0xff]  ;;  %v3544_v2 = vld [vmem:[#allocation9 + $0x1b8] sm:$0xff] }
 0x330   :  { %v2611_v7 = vpop.eup %2610 }
 0x331   :  { %v1124_v56 = vmul.f32 0.5, %v1121_v18  ;;  %v1128_v62 = vmul.f32 %v2609_v16, %v1123_v63  ;;  %v1122_v0 = vadd.f32 1.0, %v2611_v7  ;;  %v3538_v63 = vld [vmem:[#allocation9 + $0x1d8] sm:$0xff]  ;;  %v3990_v18 = vld [vmem:[#allocation31_spill] sm:$0xff]  ;;  %v3994_v7 = vld [vmem:[#allocation22_spill] sm:$0xff] }
 0x332   :  { %v3991_v16 = vld [vmem:[#allocation19_spill] sm:$0xff] }
 0x333   :  { %v1127_v17 = vmul.f32 %v1124_v56, %v3305_v8  ;;  %v1125_v54 = vmul.f32 0.5, %v1122_v0  ;;  %v3532_v8 = vld [vmem:[#allocation9 + $0x1f8] sm:$0xff]  ;;  %v3535_v56 = vld [vmem:[#allocation9 + $0x1f0] sm:$0xff] }
 0x334   :  { %3988 = vst [vmem:[#allocation29_spill] sm:$0xff] %v3532_v8  ;;  %1513 = vmatprep.subr.mxu1 %v3532_v8  ;;  %v3995_v0 = vld [vmem:[#allocation23_spill] sm:$0xff] }
 0x335   :  { %v3491_v47 = vadd.f32 %v1128_v62, %v1127_v17  ;;  %v3992_v62 = vld [vmem:[#allocation20_spill] sm:$0xff]  ;;  %v3993_v17 = vld [vmem:[#allocation21_spill] sm:$0xff] }
 0x337   :  { %2612 = vtanh.f32 %v3491_v47 }
 0x344   :  { %v2613_v52 = vpop.eup %2612 }
 0x345   :  { %v3494_v58 = vmul.f32 %v2613_v52, %v1125_v54  ;;  %v3996_v54 = vld [vmem:[#allocation24_spill] sm:$0xff]  ;;  %v3997_v52 = vld [vmem:[#allocation25_spill] sm:$0xff] }
 0x347   :  { %3987 = vst [vmem:[#allocation41_spill] sm:$0xff] %v3494_v58  ;;  %1270 = vmatmul.mubr.f32.vlgmr.msra.gmra.mxu0 %v3494_v58  ;;  %1341 = vmatmul.mubr.f32.vlgmr.msra.gmra.mxu1 %v3494_v58  ;;  %v3998_v58 = vld [vmem:[#allocation26_spill] sm:$0xff] }
 0x348   :  { %1443 = vmatpush1.msra.mxu0 %v3326_v23  ;;  %1506 = vmatprep.mubr.f32.mxu0 %v3953_v50 }
 0x349   :  { %1444 = vmatprep.subr.mxu0 %v3329_v25  ;;  %1577 = vmatprep.mubr.f32.mxu1 %v3953_v50  ;;  %v4000_v50 = vld [vmem:[#allocation28_spill] sm:$0xff] }
 0x34a   :  { %1445 = vmatpush1.msra.mxu0 %v3332_v27  ;;  %1514 = vmatpush1.msra.mxu1 %v3535_v56 }
 0x34b   :  { %1446 = vmatprep.subr.mxu0 %v3335_v29  ;;  %1515 = vmatprep.subr.mxu1 %v3538_v63 }
 0x34c   :  { %1447 = vmatpush1.msra.mxu0 %v3338_v31  ;;  %1516 = vmatpush1.msra.mxu1 %v3541_v51 }
 0x34d   :  { %1448 = vmatprep.subr.mxu0 %v3341_v33  ;;  %1517 = vmatprep.subr.mxu1 %v3544_v2 }
 0x34e   :  { %1449 = vmatpush1.msra.mxu0 %v3344_v34  ;;  %1518 = vmatpush1.msra.mxu1 %v3547_v9 }
 0x34f   :  { %1450 = vmatprep.subr.mxu0 %v3347_v36  ;;  %1519 = vmatprep.subr.mxu1 %v3550_v45 }
 0x350   :  { %1451 = vmatpush1.msra.mxu0 %v3350_v59  ;;  %1520 = vmatpush1.msra.mxu1 %v3553_v11 }
 0x351   :  { %1452 = vmatprep.subr.mxu0 %v3353_v20  ;;  %1521 = vmatprep.subr.mxu1 %v3556_v4 }
 0x352   :  { %1453 = vmatpush1.msra.mxu0 %v3359_v24  ;;  %1522 = vmatpush1.msra.mxu1 %v3559_v10 }
 0x353   :  { %1454 = vmatprep.subr.mxu0 %v3365_v28  ;;  %1523 = vmatprep.subr.mxu1 %v3355_v22 }
 0x354   :  { %1455 = vmatpush1.msra.mxu0 %v3371_v32  ;;  %1524 = vmatpush1.msra.mxu1 %v3361_v26 }
 0x355   :  { %1456 = vmatprep.subr.mxu0 %v3377_v37  ;;  %1525 = vmatprep.subr.mxu1 %v3367_v30 }
 0x356   :  { %1457 = vmatpush1.msra.mxu0 %v3381_v40  ;;  %1526 = vmatpush1.msra.mxu1 %v3373_v35 }
 0x357   :  { %1458 = vmatprep.subr.mxu0 %v3387_v41  ;;  %1527 = vmatprep.subr.mxu1 %v3379_v38 }
 0x358   :  { %1459 = vmatpush1.msra.mxu0 %v3393_v46  ;;  %1528 = vmatpush1.msra.mxu1 %v3385_v39 }
 0x359   :  { %1460 = vmatprep.subr.mxu0 %v3397_v53  ;;  %1529 = vmatprep.subr.mxu1 %v3389_v43 }
 0x35a   :  { %1461 = vmatpush1.msra.mxu0 %v3403_v60  ;;  %1530 = vmatpush1.msra.mxu1 %v3395_v48 }
 0x35b   :  { %1462 = vmatprep.subr.mxu0 %v3409_v1  ;;  %1531 = vmatprep.subr.mxu1 %v3401_v57 }
 0x35c   :  { %1463 = vmatpush1.msra.mxu0 %v3415_v5  ;;  %1532 = vmatpush1.msra.mxu1 %v3405_v55 }
 0x35d   :  { %1464 = vmatprep.subr.mxu0 %v3421_v44  ;;  %1533 = vmatprep.subr.mxu1 %v3989_v14 }
 0x35e   :  { %1465 = vmatpush1.msra.mxu0 %v3427_v61  ;;  %1534 = vmatpush1.msra.mxu1 %v3990_v18 }
 0x35f   :  { %1466 = vmatprep.subr.mxu0 %v3433_v49  ;;  %1535 = vmatprep.subr.mxu1 %v3991_v16 }
 0x360   :  { %1467 = vmatpush1.msra.mxu0 %v3439_v19  ;;  %1536 = vmatpush1.msra.mxu1 %v3992_v62 }
 0x361   :  { %1468 = vmatprep.subr.mxu0 %v3445_v3  ;;  %1537 = vmatprep.subr.mxu1 %v3993_v17 }
 0x362   :  { %1469 = vmatpush1.msra.mxu0 %v3451_v42  ;;  %1538 = vmatpush1.msra.mxu1 %v3994_v7 }
 0x363   :  { %1470 = vmatprep.subr.mxu0 %v3457_v15  ;;  %1539 = vmatprep.subr.mxu1 %v3995_v0  ;;  %v4002_v0 = vld [vmem:[#allocation47_spill] sm:$0xff] }
 0x364   :  { %1471 = vmatpush1.msra.mxu0 %v3463_v13  ;;  %1540 = vmatpush1.msra.mxu1 %v3996_v54  ;;  %v4001_v13 = vld [vmem:[#allocation46_spill] sm:$0xff] }
 0x365   :  { %1472 = vmatprep.subr.mxu0 %v3469_v6  ;;  %1541 = vmatprep.subr.mxu1 %v3997_v52  ;;  %v4003_v52 = vld [vmem:[#allocation61_spill] sm:$0xff] }
 0x366   :  { %1473 = vmatpush1.msra.mxu0 %v3475_v12  ;;  %1542 = vmatpush1.msra.mxu1 %v3998_v58 }
 0x367   :  { %1679 = vmatprep.subr.mxu0 %v3323_v21  ;;  %v3999_v21 = vld [vmem:[#allocation27_spill] sm:$0xff] }
 0x368   :  { %1543 = vmatprep.subr.mxu1 %v3999_v21  ;;  %v4004_v21 = vld [vmem:[#allocation60_spill] sm:$0xff] }
 0x369   :  { %1544 = vmatpush1.msra.mxu1 %v4000_v50 }
 0x36a   :  { %1750 = vmatprep.subr.mxu1 %v3532_v8 }
 0x407   :  { %v1271_v12 = vpop.f32.mrf.mxu0  ;;  %v1342_v6 = vpop.f32.mrf.mxu1 }
 0x408   :  { %v1347_v15 = vadd.f32 %v1271_v12, %v4001_v13  ;;  %v1349_v58 = vadd.f32 %v1342_v6, %v4004_v21 }
 0x409   :  { %v1273_v42 = vpop.f32.mrf.mxu0  ;;  %v1344_v3 = vpop.f32.mrf.mxu1 }
 0x40a   :  { %v1351_v7 = vmul.f32 0.5, %v1347_v15  ;;  %v1348_v19 = vadd.f32 %v1273_v42, %v4002_v0  ;;  %v1350_v17 = vadd.f32 %v1344_v3, %v4003_v52  ;;  %v1353_v50 = vmul.f32 0.5, %v1349_v58  ;;  %v4010_v58 = vld [vmem:[#allocation21_spill] sm:$0xff]  ;;  %v4014_v0 = vld [vmem:[#allocation23_spill] sm:$0xff]  ;;  %v4016_v52 = vld [vmem:[#allocation24_spill] sm:$0xff] }
 0x40c   :  { %2614 = vtanh.f32 %v1351_v7  ;;  %v1352_v54 = vmul.f32 0.5, %v1348_v19 }
 0x40e   :  { %2616 = vtanh.f32 %v1352_v54  ;;  %v4015_v54 = vld [vmem:[#allocation36_spill] sm:$0xff] }
 0x40f   :  { %2618 = vtanh.f32 %v1350_v17 }
 0x410   :  { %2620 = vtanh.f32 %v1353_v50  ;;  %v4006_v50 = vld [vmem:[#allocation19_spill] sm:$0xff] }
 0x419   :  { %v2615_v49 = vpop.eup %2614 }
 0x41a   :  { %v1357_v8 = vadd.f32 1.0, %v2615_v49  ;;  %v4008_v49 = vld [vmem:[#allocation20_spill] sm:$0xff] }
 0x41b   :  { %v2617_v62 = vpop.eup %2616 }
 0x41c   :  { %v1360_v61 = vmul.f32 0.5, %v1357_v8  ;;  %v1358_v13 = vadd.f32 1.0, %v2617_v62  ;;  %v2619_v12 = vpop.eup %2618  ;;  %v4011_v8 = vld [vmem:[#allocation34_spill] sm:$0xff]  ;;  %v4013_v62 = vld [vmem:[#allocation35_spill] sm:$0xff] }
 0x41d   :  { %v2621_v19 = vpop.eup %2620 }
 0x41e   :  { %v1361_v16 = vmul.f32 0.5, %v1358_v13  ;;  %v1365_v15 = vmul.f32 %v2619_v12, %v1360_v61  ;;  %v1359_v3 = vadd.f32 1.0, %v2621_v19  ;;  %v4007_v61 = vld [vmem:[#allocation32_spill] sm:$0xff]  ;;  %v4017_v13 = vld [vmem:[#allocation37_spill] sm:$0xff]  ;;  %v4021_v19 = vld [vmem:[#allocation39_spill] sm:$0xff] }
 0x41f   :  { %v4018_v12 = vld [vmem:[#allocation25_spill] sm:$0xff] }
 0x420   :  { %v1364_v42 = vmul.f32 %v1361_v16, %v3491_v47  ;;  %v1362_v17 = vmul.f32 0.5, %v1359_v3  ;;  %v4009_v47 = vld [vmem:[#allocation33_spill] sm:$0xff]  ;;  %v4012_v16 = vld [vmem:[#allocation22_spill] sm:$0xff]  ;;  %v4022_v3 = vld [vmem:[#allocation27_spill] sm:$0xff] }
 0x422   :  { %v3590_v7 = vadd.f32 %v1365_v15, %v1364_v42  ;;  %v4019_v15 = vld [vmem:[#allocation38_spill] sm:$0xff] }
 0x423   :  { %v4020_v42 = vld [vmem:[#allocation26_spill] sm:$0xff] }
 0x424   :  { %2622 = vtanh.f32 %v3590_v7 }
 0x431   :  { %v2623_v21 = vpop.eup %2622 }
 0x432   :  { %v3593_v6 = vmul.f32 %v2623_v21, %v1362_v17  ;;  %v4023_v17 = vld [vmem:[#allocation40_spill] sm:$0xff]  ;;  %v4024_v21 = vmov 0.0  }
 0x434   :  { %4005 = vst [vmem:[#allocation42_spill] sm:$0xff] %v3593_v6  ;;  %1507 = vmatmul.mubr.f32.vlgmr.msra.gmra.mxu0 %v3593_v6  ;;  %1578 = vmatmul.mubr.f32.vlgmr.msra.gmra.mxu1 %v3593_v6  ;;  %v4025_v6 = vld [vmem:[#allocation28_spill] sm:$0xff] }
 0x435   :  { %1680 = vmatpush1.msra.mxu0 %v3326_v23  ;;  %1751 = vmatpush1.msra.mxu1 %v3535_v56 }
 0x436   :  { %1681 = vmatprep.subr.mxu0 %v3329_v25  ;;  %1752 = vmatprep.subr.mxu1 %v3538_v63 }
 0x437   :  { %1682 = vmatpush1.msra.mxu0 %v3332_v27  ;;  %1753 = vmatpush1.msra.mxu1 %v3541_v51 }
 0x438   :  { %1683 = vmatprep.subr.mxu0 %v3335_v29  ;;  %1754 = vmatprep.subr.mxu1 %v3544_v2 }
 0x439   :  { %1684 = vmatpush1.msra.mxu0 %v3338_v31  ;;  %1755 = vmatpush1.msra.mxu1 %v3547_v9 }
 0x43a   :  { %1685 = vmatprep.subr.mxu0 %v3341_v33  ;;  %1756 = vmatprep.subr.mxu1 %v3550_v45 }
 0x43b   :  { %1686 = vmatpush1.msra.mxu0 %v3344_v34  ;;  %1757 = vmatpush1.msra.mxu1 %v3553_v11 }
 0x43c   :  { %1687 = vmatprep.subr.mxu0 %v3347_v36  ;;  %1758 = vmatprep.subr.mxu1 %v3556_v4 }
 0x43d   :  { %1688 = vmatpush1.msra.mxu0 %v3350_v59  ;;  %1759 = vmatpush1.msra.mxu1 %v3559_v10 }
 0x43e   :  { %1689 = vmatprep.subr.mxu0 %v3353_v20  ;;  %1760 = vmatprep.subr.mxu1 %v3355_v22 }
 0x43f   :  { %1690 = vmatpush1.msra.mxu0 %v3359_v24  ;;  %1761 = vmatpush1.msra.mxu1 %v3361_v26 }
 0x440   :  { %1691 = vmatprep.subr.mxu0 %v3365_v28  ;;  %1762 = vmatprep.subr.mxu1 %v3367_v30 }
 0x441   :  { %1692 = vmatpush1.msra.mxu0 %v3371_v32  ;;  %1763 = vmatpush1.msra.mxu1 %v3373_v35 }
 0x442   :  { %1693 = vmatprep.subr.mxu0 %v3377_v37  ;;  %1764 = vmatprep.subr.mxu1 %v3379_v38 }
 0x443   :  { %1694 = vmatpush1.msra.mxu0 %v3381_v40  ;;  %1765 = vmatpush1.msra.mxu1 %v3385_v39 }
 0x444   :  { %1695 = vmatprep.subr.mxu0 %v3387_v41  ;;  %1766 = vmatprep.subr.mxu1 %v3389_v43 }
 0x445   :  { %1696 = vmatpush1.msra.mxu0 %v3393_v46  ;;  %1767 = vmatpush1.msra.mxu1 %v3395_v48 }
 0x446   :  { %1697 = vmatprep.subr.mxu0 %v3397_v53  ;;  %1768 = vmatprep.subr.mxu1 %v3401_v57 }
 0x447   :  { %1698 = vmatpush1.msra.mxu0 %v3403_v60  ;;  %1769 = vmatpush1.msra.mxu1 %v3405_v55 }
 0x448   :  { %1699 = vmatprep.subr.mxu0 %v3409_v1  ;;  %1770 = vmatprep.subr.mxu1 %v3989_v14 }
 0x449   :  { %1700 = vmatpush1.msra.mxu0 %v3415_v5  ;;  %1771 = vmatpush1.msra.mxu1 %v3990_v18 }
 0x44a   :  { %1701 = vmatprep.subr.mxu0 %v3421_v44  ;;  %1772 = vmatprep.subr.mxu1 %v4006_v50 }
 0x44b   :  { %1702 = vmatpush1.msra.mxu0 %v4007_v61  ;;  %1773 = vmatpush1.msra.mxu1 %v4008_v49 }
 0x44c   :  { %1703 = vmatprep.subr.mxu0 %v4009_v47  ;;  %1774 = vmatprep.subr.mxu1 %v4010_v58 }
 0x44d   :  { %1704 = vmatpush1.msra.mxu0 %v4011_v8  ;;  %1775 = vmatpush1.msra.mxu1 %v4012_v16  ;;  %v4030_v8 = vld [vmem:[#allocation63_spill] sm:$0xff] }
 0x44e   :  { %1705 = vmatprep.subr.mxu0 %v4013_v62  ;;  %1776 = vmatprep.subr.mxu1 %v4014_v0 }
 0x44f   :  { %1706 = vmatpush1.msra.mxu0 %v4015_v54  ;;  %1777 = vmatpush1.msra.mxu1 %v4016_v52  ;;  %v4026_v52 = vld [vmem:[#allocation30_spill] sm:$0xff]  ;;  %v4028_v54 = vld [vmem:[#allocation48_spill] sm:$0xff] }
 0x450   :  { %1707 = vmatprep.subr.mxu0 %v4017_v13  ;;  %1778 = vmatprep.subr.mxu1 %v4018_v12  ;;  %v4027_v13 = vld [vmem:[#allocation29_spill] sm:$0xff] }
 0x451   :  { %1708 = vmatpush1.msra.mxu0 %v4019_v15  ;;  %1779 = vmatpush1.msra.mxu1 %v4020_v42 }
 0x452   :  { %1709 = vmatprep.subr.mxu0 %v4021_v19  ;;  %1780 = vmatprep.subr.mxu1 %v4022_v3  ;;  %v4029_v3 = vld [vmem:[#allocation49_spill] sm:$0xff] }
 0x453   :  { %1710 = vmatpush1.msra.mxu0 %v4023_v17  ;;  %1743 = vmatprep.mubr.f32.mxu0 %v4024_v21 }
 0x454   :  { %1781 = vmatpush1.msra.mxu1 %v4025_v6  ;;  %1814 = vmatprep.mubr.f32.mxu1 %v4024_v21  ;;  %v4031_v6 = vld [vmem:[#allocation62_spill] sm:$0xff] }
 0x455   :  { %1916 = vmatprep.subr.mxu0 %v4026_v52  ;;  %1987 = vmatprep.subr.mxu1 %v4027_v13 }
 0x4f4   :  { %v1508_v12 = vpop.f32.mrf.mxu0  ;;  %v1579_v15 = vpop.f32.mrf.mxu1 }
 0x4f5   :  { %v1584_v42 = vadd.f32 %v1508_v12, %v4028_v54  ;;  %v1586_v21 = vadd.f32 %v1579_v15, %v4031_v6 }
 0x4f6   :  { %v1510_v0 = vpop.f32.mrf.mxu0  ;;  %v1581_v19 = vpop.f32.mrf.mxu1 }
 0x4f7   :  { %v1588_v62 = vmul.f32 0.5, %v1584_v42  ;;  %v1585_v16 = vadd.f32 %v1510_v0, %v4029_v3  ;;  %v1587_v58 = vadd.f32 %v1581_v19, %v4030_v8  ;;  %v1590_v52 = vmul.f32 0.5, %v1586_v21 }
 0x4f9   :  { %2624 = vtanh.f32 %v1588_v62  ;;  %v1589_v17 = vmul.f32 0.5, %v1585_v16 }
 0x4fb   :  { %2626 = vtanh.f32 %v1589_v17 }
 0x4fc   :  { %2628 = vtanh.f32 %v1587_v58 }
 0x4fd   :  { %2630 = vtanh.f32 %v1590_v52 }
 0x506   :  { %v2625_v47 = vpop.eup %2624 }
 0x507   :  { %v1594_v13 = vadd.f32 1.0, %v2625_v47 }
 0x508   :  { %v2627_v49 = vpop.eup %2626 }
 0x509   :  { %v1597_v61 = vmul.f32 0.5, %v1594_v13  ;;  %v1595_v54 = vadd.f32 1.0, %v2627_v49  ;;  %v2629_v12 = vpop.eup %2628 }
 0x50a   :  { %v2631_v8 = vpop.eup %2630 }
 0x50b   :  { %v1598_v50 = vmul.f32 0.5, %v1595_v54  ;;  %v1602_v42 = vmul.f32 %v2629_v12, %v1597_v61  ;;  %v1596_v58 = vadd.f32 1.0, %v2631_v8 }
 0x50d   :  { %v1601_v0 = vmul.f32 %v1598_v50, %v3590_v7  ;;  %v1599_v16 = vmul.f32 0.5, %v1596_v58 }
 0x50f   :  { %v3668_v62 = vadd.f32 %v1602_v42, %v1601_v0 }
 0x511   :  { %2632 = vtanh.f32 %v3668_v62 }
 0x51e   :  { %v2633_v6 = vpop.eup %2632 }
 0x51f   :  { %v3671_v15 = vmul.f32 %v2633_v6, %v1599_v16  ;;  %v2145_v16 = vld [vmem:[#allocation9 + $0x1c0] sm:$0xff] }
 0x520   :  { %v2129_v6 = vld [vmem:[#allocation9 + $0x140] sm:$0xff] }
 0x521   :  { %1744 = vmatmul.mubr.f32.vlgmr.msra.gmra.mxu0 %v3671_v15  ;;  %1815 = vmatmul.mubr.f32.vlgmr.msra.gmra.mxu1 %v3671_v15 }
 0x522   :  { %1917 = vmatpush1.msra.mxu0 %v3326_v23  ;;  %1988 = vmatpush1.msra.mxu1 %v3535_v56  ;;  %v4032_v23 = vld [vmem:[#allocation19_spill] sm:$0xff] }
 0x523   :  { %1918 = vmatprep.subr.mxu0 %v3329_v25  ;;  %1989 = vmatprep.subr.mxu1 %v3538_v63  ;;  %v4033_v25 = vld [vmem:[#allocation32_spill] sm:$0xff] }
 0x524   :  { %1919 = vmatpush1.msra.mxu0 %v3332_v27  ;;  %1990 = vmatpush1.msra.mxu1 %v3541_v51  ;;  %v4034_v27 = vld [vmem:[#allocation20_spill] sm:$0xff] }
 0x525   :  { %1920 = vmatprep.subr.mxu0 %v3335_v29  ;;  %1991 = vmatprep.subr.mxu1 %v3544_v2  ;;  %v4035_v29 = vld [vmem:[#allocation33_spill] sm:$0xff] }
 0x526   :  { %1921 = vmatpush1.msra.mxu0 %v3338_v31  ;;  %1992 = vmatpush1.msra.mxu1 %v3547_v9  ;;  %v4036_v31 = vld [vmem:[#allocation21_spill] sm:$0xff] }
 0x527   :  { %1922 = vmatprep.subr.mxu0 %v3341_v33  ;;  %1993 = vmatprep.subr.mxu1 %v3550_v45  ;;  %v4037_v33 = vld [vmem:[#allocation34_spill] sm:$0xff] }
 0x528   :  { %1923 = vmatpush1.msra.mxu0 %v3344_v34  ;;  %1994 = vmatpush1.msra.mxu1 %v3553_v11  ;;  %v4038_v34 = vld [vmem:[#allocation22_spill] sm:$0xff] }
 0x529   :  { %1924 = vmatprep.subr.mxu0 %v3347_v36  ;;  %1995 = vmatprep.subr.mxu1 %v3556_v4  ;;  %v4039_v36 = vld [vmem:[#allocation35_spill] sm:$0xff] }
 0x52a   :  { %1925 = vmatpush1.msra.mxu0 %v3350_v59  ;;  %1996 = vmatpush1.msra.mxu1 %v3559_v10  ;;  %v4040_v59 = vld [vmem:[#allocation23_spill] sm:$0xff] }
 0x52b   :  { %1926 = vmatprep.subr.mxu0 %v3353_v20  ;;  %1997 = vmatprep.subr.mxu1 %v3355_v22  ;;  %v4041_v20 = vld [vmem:[#allocation36_spill] sm:$0xff] }
 0x52c   :  { %1927 = vmatpush1.msra.mxu0 %v3359_v24  ;;  %1998 = vmatpush1.msra.mxu1 %v3361_v26  ;;  %v4042_v22 = vld [vmem:[#allocation24_spill] sm:$0xff]  ;;  %v4043_v24 = vld [vmem:[#allocation37_spill] sm:$0xff] }
 0x52d   :  { %1928 = vmatprep.subr.mxu0 %v3365_v28  ;;  %1999 = vmatprep.subr.mxu1 %v3367_v30  ;;  %v4044_v26 = vld [vmem:[#allocation25_spill] sm:$0xff]  ;;  %v4045_v28 = vld [vmem:[#allocation38_spill] sm:$0xff] }
 0x52e   :  { %1929 = vmatpush1.msra.mxu0 %v3371_v32  ;;  %2000 = vmatpush1.msra.mxu1 %v3373_v35  ;;  %v4046_v30 = vld [vmem:[#allocation26_spill] sm:$0xff]  ;;  %v4047_v32 = vld [vmem:[#allocation39_spill] sm:$0xff] }
 0x52f   :  { %1930 = vmatprep.subr.mxu0 %v3377_v37  ;;  %2001 = vmatprep.subr.mxu1 %v3379_v38  ;;  %v4048_v35 = vld [vmem:[#allocation27_spill] sm:$0xff]  ;;  %v4049_v37 = vld [vmem:[#allocation40_spill] sm:$0xff]  ;;  %v4050_v38 = vmov 0.0  }
 0x530   :  { %1931 = vmatpush1.msra.mxu0 %v3381_v40  ;;  %2002 = vmatpush1.msra.mxu1 %v3385_v39  ;;  %v4051_v40 = vld [vmem:[#allocation28_spill] sm:$0xff]  ;;  %v4052_v39 = vld [vmem:[#allocation29_spill] sm:$0xff] }
 0x531   :  { %1932 = vmatprep.subr.mxu0 %v3387_v41  ;;  %2003 = vmatprep.subr.mxu1 %v3389_v43 }
 0x532   :  { %1933 = vmatpush1.msra.mxu0 %v3393_v46  ;;  %2004 = vmatpush1.msra.mxu1 %v3395_v48  ;;  %v4053_v46 = vld [vmem:[#allocation50_spill] sm:$0xff] }
 0x533   :  { %1934 = vmatprep.subr.mxu0 %v3397_v53  ;;  %2005 = vmatprep.subr.mxu1 %v3401_v57 }
 0x534   :  { %1935 = vmatpush1.msra.mxu0 %v3403_v60  ;;  %2006 = vmatpush1.msra.mxu1 %v3405_v55  ;;  %v4054_v55 = vld [vmem:[#allocation51_spill] sm:$0xff] }
 0x535   :  { %1936 = vmatprep.subr.mxu0 %v3409_v1  ;;  %2007 = vmatprep.subr.mxu1 %v3989_v14 }
 0x536   :  { %1937 = vmatpush1.msra.mxu0 %v3415_v5  ;;  %2008 = vmatpush1.msra.mxu1 %v3990_v18  ;;  %v4056_v18 = vld [vmem:[#allocation64_spill] sm:$0xff] }
 0x537   :  { %1938 = vmatprep.subr.mxu0 %v3421_v44  ;;  %2009 = vmatprep.subr.mxu1 %v4032_v23  ;;  %v4055_v44 = vld [vmem:[#allocation65_spill] sm:$0xff]  ;;  %v2132_v23 = vld [vmem:[#allocation9 + $0x158] sm:$0xff] }
 0x538   :  { %1939 = vmatpush1.msra.mxu0 %v4033_v25  ;;  %2010 = vmatpush1.msra.mxu1 %v4034_v27  ;;  %v2126_v25 = vld [vmem:[#allocation9 + $0x128] sm:$0xff]  ;;  %v2131_v27 = vld [vmem:[#allocation9 + $0x150] sm:$0xff] }
 0x539   :  { %1940 = vmatprep.subr.mxu0 %v4035_v29  ;;  %2011 = vmatprep.subr.mxu1 %v4036_v31  ;;  %v2125_v29 = vld [vmem:[#allocation9 + $0x120] sm:$0xff]  ;;  %v2128_v31 = vld [vmem:[#allocation9 + $0x138] sm:$0xff] }
 0x53a   :  { %1941 = vmatpush1.msra.mxu0 %v4037_v33  ;;  %2012 = vmatpush1.msra.mxu1 %v4038_v34  ;;  %v2122_v33 = vld [vmem:[#allocation9 + $0x108] sm:$0xff]  ;;  %v2127_v34 = vld [vmem:[#allocation9 + $0x130] sm:$0xff] }
 0x53b   :  { %1942 = vmatprep.subr.mxu0 %v4039_v36  ;;  %2013 = vmatprep.subr.mxu1 %v4040_v59  ;;  %v2121_v36 = vld [vmem:[#allocation9 + $0x100] sm:$0xff]  ;;  %v2124_v59 = vld [vmem:[#allocation9 + $0x118] sm:$0xff] }
 0x53c   :  { %1943 = vmatpush1.msra.mxu0 %v4041_v20  ;;  %2014 = vmatpush1.msra.mxu1 %v4042_v22  ;;  %v2118_v20 = vld [vmem:[#allocation9 + $0xe8] sm:$0xff]  ;;  %v2123_v22 = vld [vmem:[#allocation9 + $0x110] sm:$0xff] }
 0x53d   :  { %1944 = vmatprep.subr.mxu0 %v4043_v24  ;;  %2015 = vmatprep.subr.mxu1 %v4044_v26  ;;  %v2117_v24 = vld [vmem:[#allocation9 + $0xe0] sm:$0xff]  ;;  %v2120_v26 = vld [vmem:[#allocation9 + $0xf8] sm:$0xff] }
 0x53e   :  { %1945 = vmatpush1.msra.mxu0 %v4045_v28  ;;  %2016 = vmatpush1.msra.mxu1 %v4046_v30  ;;  %v2114_v28 = vld [vmem:[#allocation9 + $0xc8] sm:$0xff]  ;;  %v2119_v30 = vld [vmem:[#allocation9 + $0xf0] sm:$0xff] }
 0x53f   :  { %1946 = vmatprep.subr.mxu0 %v4047_v32  ;;  %2017 = vmatprep.subr.mxu1 %v4048_v35  ;;  %v2113_v32 = vld [vmem:[#allocation9 + $0xc0] sm:$0xff]  ;;  %v2116_v35 = vld [vmem:[#allocation9 + $0xd8] sm:$0xff] }
 0x540   :  { %1947 = vmatpush1.msra.mxu0 %v4049_v37  ;;  %1980 = vmatprep.mubr.f32.mxu0 %v4050_v38  ;;  %v2110_v37 = vld [vmem:[#allocation9 + $0xa8] sm:$0xff] }
 0x541   :  { %2018 = vmatpush1.msra.mxu1 %v4051_v40  ;;  %2051 = vmatprep.mubr.f32.mxu1 %v4050_v38  ;;  %v2109_v40 = vld [vmem:[#allocation9 + $0xa0] sm:$0xff] }
 0x542   :  { %2224 = vmatprep.subr.mxu1 %v4052_v39  ;;  %v2112_v39 = vld [vmem:[#allocation9 + $0xb8] sm:$0xff] }
 0x5e1   :  { %v1745_v41 = vpop.f32.mrf.mxu0  ;;  %v1816_v43 = vpop.f32.mrf.mxu1 }
 0x5e2   :  { %v1821_v48 = vadd.f32 %v1745_v41, %v4053_v46  ;;  %v1823_v7 = vadd.f32 %v1816_v43, %v4056_v18  ;;  %v2106_v41 = vld [vmem:[#allocation9 + $0x88] sm:$0xff]  ;;  %v2111_v43 = vld [vmem:[#allocation9 + $0xb0] sm:$0xff]  ;;  %v2105_v46 = vld [vmem:[#allocation9 + $0x80] sm:$0xff] }
 0x5e3   :  { %v1747_v53 = vpop.f32.mrf.mxu0  ;;  %v1818_v57 = vpop.f32.mrf.mxu1  ;;  %v2094_v18 = vld [vmem:[#allocation9 + $0x28] sm:$0xff] }
 0x5e4   :  { %v1825_v60 = vmul.f32 0.5, %v1821_v48  ;;  %v1822_v1 = vadd.f32 %v1747_v53, %v4054_v55  ;;  %v1824_v14 = vadd.f32 %v1818_v57, %v4055_v44  ;;  %v1827_v50 = vmul.f32 0.5, %v1823_v7  ;;  %v2108_v48 = vld [vmem:[#allocation9 + $0x98] sm:$0xff]  ;;  %v2102_v53 = vld [vmem:[#allocation9 + $0x68] sm:$0xff]  ;;  %v2107_v57 = vld [vmem:[#allocation9 + $0x90] sm:$0xff] }
 0x5e5   :  { %v2104_v55 = vld [vmem:[#allocation9 + $0x78] sm:$0xff]  ;;  %v2097_v44 = vld [vmem:[#allocation9 + $0x40] sm:$0xff]  ;;  %v2099_v7 = vld [vmem:[#allocation9 + $0x50] sm:$0xff] }
 0x5e6   :  { %2634 = vtanh.f32 %v1825_v60  ;;  %v1826_v5 = vmul.f32 0.5, %v1822_v1  ;;  %v2101_v60 = vld [vmem:[#allocation9 + $0x60] sm:$0xff]  ;;  %v2098_v1 = vld [vmem:[#allocation9 + $0x48] sm:$0xff] }
 0x5e8   :  { %2636 = vtanh.f32 %v1826_v5  ;;  %v2103_v5 = vld [vmem:[#allocation9 + $0x70] sm:$0xff] }
 0x5e9   :  { %2638 = vtanh.f32 %v1824_v14  ;;  %v2100_v14 = vld [vmem:[#allocation9 + $0x58] sm:$0xff] }
 0x5ea   :  { %2640 = vtanh.f32 %v1827_v50  ;;  %v2093_v50 = vld [vmem:[#allocation9 + $0x20] sm:$0xff] }
 0x5f3   :  { %v2635_v61 = vpop.eup %2634 }
 0x5f4   :  { %v1831_v49 = vadd.f32 1.0, %v2635_v61  ;;  %v2096_v61 = vld [vmem:[#allocation9 + $0x38] sm:$0xff] }
 0x5f5   :  { %v2637_v47 = vpop.eup %2636 }
 0x5f6   :  { %v1834_v13 = vmul.f32 0.5, %v1831_v49  ;;  %v1832_v19 = vadd.f32 1.0, %v2637_v47  ;;  %v2639_v3 = vpop.eup %2638  ;;  %v2090_v49 = vld [vmem:[#allocation9 + $0x8] sm:$0xff]  ;;  %v2095_v47 = vld [vmem:[#allocation9 + $0x30] sm:$0xff] }
 0x5f7   :  { %v2641_v12 = vpop.eup %2640 }
 0x5f8   :  { %v1835_v17 = vmul.f32 0.5, %v1832_v19  ;;  %v1839_v21 = vmul.f32 %v2639_v3, %v1834_v13  ;;  %v1833_v42 = vadd.f32 1.0, %v2641_v12  ;;  %v2089_v13 = vld [vmem:[#allocation9] sm:$0xff]  ;;  %v2092_v19 = vld [vmem:[#allocation9 + $0x18] sm:$0xff]  ;;  %v2091_v3 = vld [vmem:[#allocation9 + $0x10] sm:$0xff] }
 0x5f9   :  { %v4057_v12 = vld [vmem:[#allocation52_spill] sm:$0xff] }
 0x5fa   :  { %v1838_v52 = vmul.f32 %v1835_v17, %v3668_v62  ;;  %v1836_v0 = vmul.f32 0.5, %v1833_v42  ;;  %v2149_v62 = vld [vmem:[#allocation9 + $0x1e0] sm:$0xff]  ;;  %v2342_v17 = vld [vmem:[#allocation10 + $0x78] sm:$0xff] }
 0x5fc   :  { %v3745_v54 = vadd.f32 %v1839_v21, %v1838_v52 }
 0x5fe   :  { %2642 = vtanh.f32 %v3745_v54 }
 0x60b   :  { %v2643_v8 = vpop.eup %2642 }
 0x60c   :  { %v3748_v58 = vmul.f32 %v2643_v8, %v1836_v0 }
 0x60e   :  { %1981 = vmatmul.mubr.f32.vlgmr.msra.gmra.mxu0 %v3748_v58  ;;  %2052 = vmatmul.mubr.f32.vlgmr.msra.gmra.mxu1 %v3748_v58 }
 0x60f   :  { %2225 = vmatpush1.msra.mxu1 %v3535_v56  ;;  %2217 = vmatprep.mubr.f32.mxu0 %v4050_v38  ;;  %v2150_v56 = vld [vmem:[#allocation9 + $0x1e8] sm:$0xff] }
 0x610   :  { %2226 = vmatprep.subr.mxu1 %v3538_v63  ;;  %2288 = vmatprep.mubr.f32.mxu1 %v4050_v38  ;;  %v2146_v63 = vld [vmem:[#allocation9 + $0x1c8] sm:$0xff]  ;;  %v2115_v38 = vld [vmem:[#allocation9 + $0xd0] sm:$0xff] }
 0x611   :  { %2227 = vmatpush1.msra.mxu1 %v3541_v51  ;;  %2153 = vmatprep.subr.mxu0 %v2150_v56  ;;  %v2142_v51 = vld [vmem:[#allocation9 + $0x1a8] sm:$0xff] }
 0x612   :  { %2228 = vmatprep.subr.mxu1 %v3544_v2  ;;  %2154 = vmatpush1.msra.mxu0 %v2149_v62  ;;  %v2141_v2 = vld [vmem:[#allocation9 + $0x1a0] sm:$0xff] }
 0x613   :  { %2229 = vmatpush1.msra.mxu1 %v3547_v9  ;;  %2155 = vmatprep.subr.mxu0 %v2146_v63  ;;  %v2138_v9 = vld [vmem:[#allocation9 + $0x188] sm:$0xff]  ;;  %v4058_v62 = vld [vmem:[#allocation53_spill] sm:$0xff] }
 0x614   :  { %2230 = vmatprep.subr.mxu1 %v3550_v45  ;;  %2156 = vmatpush1.msra.mxu0 %v2145_v16  ;;  %v2137_v45 = vld [vmem:[#allocation9 + $0x180] sm:$0xff] }
 0x615   :  { %2231 = vmatpush1.msra.mxu1 %v3553_v11  ;;  %2157 = vmatprep.subr.mxu0 %v2142_v51  ;;  %v2134_v11 = vld [vmem:[#allocation9 + $0x168] sm:$0xff]  ;;  %v4059_v51 = vld [vmem:[#allocation67_spill] sm:$0xff] }
 0x616   :  { %2232 = vmatprep.subr.mxu1 %v3556_v4  ;;  %2158 = vmatpush1.msra.mxu0 %v2141_v2  ;;  %v2133_v4 = vld [vmem:[#allocation9 + $0x160] sm:$0xff] }
 0x617   :  { %2233 = vmatpush1.msra.mxu1 %v3559_v10  ;;  %2159 = vmatprep.subr.mxu0 %v2138_v9  ;;  %v2130_v10 = vld [vmem:[#allocation9 + $0x148] sm:$0xff] }
 0x618   :  { %2160 = vmatpush1.msra.mxu0 %v2137_v45  ;;  %2234 = vmatprep.subr.mxu1 %v2132_v23  ;;  %v4060_v9 = vld [vmem:[#allocation66_spill] sm:$0xff] }
 0x619   :  { %2161 = vmatprep.subr.mxu0 %v2134_v11  ;;  %2235 = vmatpush1.msra.mxu1 %v2131_v27 }
 0x61a   :  { %2162 = vmatpush1.msra.mxu0 %v2133_v4  ;;  %2236 = vmatprep.subr.mxu1 %v2128_v31 }
 0x61b   :  { %2163 = vmatprep.subr.mxu0 %v2130_v10  ;;  %2237 = vmatpush1.msra.mxu1 %v2127_v34 }
 0x61c   :  { %2164 = vmatpush1.msra.mxu0 %v2129_v6  ;;  %2238 = vmatprep.subr.mxu1 %v2124_v59 }
 0x61d   :  { %2165 = vmatprep.subr.mxu0 %v2126_v25  ;;  %2239 = vmatpush1.msra.mxu1 %v2123_v22 }
 0x61e   :  { %2166 = vmatpush1.msra.mxu0 %v2125_v29  ;;  %2240 = vmatprep.subr.mxu1 %v2120_v26  ;;  %v2341_v26 = vld [vmem:[#allocation10 + $0x70] sm:$0xff] }
 0x61f   :  { %2167 = vmatprep.subr.mxu0 %v2122_v33  ;;  %2241 = vmatpush1.msra.mxu1 %v2119_v30  ;;  %v2340_v30 = vld [vmem:[#allocation10 + $0x68] sm:$0xff] }
 0x620   :  { %2168 = vmatpush1.msra.mxu0 %v2121_v36  ;;  %2242 = vmatprep.subr.mxu1 %v2116_v35  ;;  %v2337_v35 = vld [vmem:[#allocation10 + $0x50] sm:$0xff] }
 0x621   :  { %2169 = vmatprep.subr.mxu0 %v2118_v20  ;;  %2243 = vmatpush1.msra.mxu1 %v2115_v38  ;;  %v2335_v38 = vld [vmem:[#allocation10 + $0x40] sm:$0xff] }
 0x622   :  { %2170 = vmatpush1.msra.mxu0 %v2117_v24  ;;  %2244 = vmatprep.subr.mxu1 %v2112_v39  ;;  %v2333_v39 = vld [vmem:[#allocation10 + $0x30] sm:$0xff] }
 0x623   :  { %2171 = vmatprep.subr.mxu0 %v2114_v28  ;;  %2245 = vmatpush1.msra.mxu1 %v2111_v43  ;;  %v4061_v28 = vld [vmem:[#allocation70_spill] sm:$0xff]  ;;  %v2331_v43 = vld [vmem:[#allocation10 + $0x20] sm:$0xff] }
 0x624   :  { %2172 = vmatpush1.msra.mxu0 %v2113_v32  ;;  %2246 = vmatprep.subr.mxu1 %v2108_v48  ;;  %v2339_v32 = vld [vmem:[#allocation10 + $0x60] sm:$0xff]  ;;  %v2329_v48 = vld [vmem:[#allocation10 + $0x10] sm:$0xff] }
 0x625   :  { %2173 = vmatprep.subr.mxu0 %v2110_v37  ;;  %2247 = vmatpush1.msra.mxu1 %v2107_v57  ;;  %v2336_v37 = vld [vmem:[#allocation10 + $0x48] sm:$0xff]  ;;  %v2327_v57 = vld [vmem:[#allocation10] sm:$0xff] }
 0x626   :  { %2174 = vmatpush1.msra.mxu0 %v2109_v40  ;;  %2248 = vmatprep.subr.mxu1 %v2104_v55  ;;  %v2334_v40 = vld [vmem:[#allocation10 + $0x38] sm:$0xff]  ;;  %v4063_v55 = vld [vmem:[#allocation41_spill] sm:$0xff] }
 0x627   :  { %2175 = vmatprep.subr.mxu0 %v2106_v41  ;;  %2249 = vmatpush1.msra.mxu1 %v2103_v5  ;;  %v2332_v41 = vld [vmem:[#allocation10 + $0x28] sm:$0xff] }
 0x628   :  { %2176 = vmatpush1.msra.mxu0 %v2105_v46  ;;  %2250 = vmatprep.subr.mxu1 %v2100_v14  ;;  %v2330_v46 = vld [vmem:[#allocation10 + $0x18] sm:$0xff]  ;;  %v4065_v14 = vld [vmem:[#allocation54_spill] sm:$0xff] }
 0x629   :  { %2177 = vmatprep.subr.mxu0 %v2102_v53  ;;  %2251 = vmatpush1.msra.mxu1 %v2099_v7  ;;  %v2328_v53 = vld [vmem:[#allocation10 + $0x8] sm:$0xff] }
 0x62a   :  { %2178 = vmatpush1.msra.mxu0 %v2101_v60  ;;  %2252 = vmatprep.subr.mxu1 %v2096_v61  ;;  %v4062_v60 = vld [vmem:[#allocation17_spill] sm:$0xff] }
 0x62b   :  { %2179 = vmatprep.subr.mxu0 %v2098_v1  ;;  %2253 = vmatpush1.msra.mxu1 %v2095_v47  ;;  %v4064_v1 = vld [vmem:[#allocation42_spill] sm:$0xff] }
 0x62c   :  { %2180 = vmatpush1.msra.mxu0 %v2097_v44  ;;  %2254 = vmatprep.subr.mxu1 %v2092_v19  ;;  %v4067_v19 = vld [vmem:[#allocation69_spill] sm:$0xff] }
 0x62d   :  { %2181 = vmatprep.subr.mxu0 %v2094_v18  ;;  %2255 = vmatpush1.msra.mxu1 %v2091_v3 }
 0x62e   :  { %2182 = vmatpush1.msra.mxu0 %v2093_v50 }
 0x62f   :  { %2183 = vmatprep.subr.mxu0 %v2090_v49  ;;  %v4066_v49 = vld [vmem:[#allocation55_spill] sm:$0xff] }
 0x630   :  { %2184 = vmatpush1.msra.mxu0 %v2089_v13 }
 0x631   :  { %2530 = vmatprep.subr.mxu0 %v2342_v17 }
 0x6ce   :  { %v1982_v21 = vpop.f32.mrf.mxu0  ;;  %v2053_v52 = vpop.f32.mrf.mxu1 }
 0x6cf   :  { %v2058_v42 = vadd.f32 %v1982_v21, %v4057_v12  ;;  %v2060_v45 = vadd.f32 %v2053_v52, %v4060_v9 }
 0x6d0   :  { %v1984_v0 = vpop.f32.mrf.mxu0  ;;  %v2055_v8 = vpop.f32.mrf.mxu1 }
 0x6d1   :  { %v2062_v56 = vmul.f32 0.5, %v2058_v42  ;;  %v2059_v63 = vadd.f32 %v1984_v0, %v4058_v62  ;;  %v2061_v2 = vadd.f32 %v2055_v8, %v4059_v51  ;;  %v2064_v11 = vmul.f32 0.5, %v2060_v45  ;;  %v2505_v51 = vld [vmem:[%s3796_s5] ss:$0 sm:$0xff]  ;;  %s2781_s5 = smov [#allocation12]  }
 0x6d2   :  { %s2468_s20 = sshll.u32 %s2781_s5, 4  ;;  %s2469_s20 = int_to_ptr.vmem [resolvable:$true] %s2468_s20 }
 0x6d3   :  { %2644 = vtanh.f32 %v2062_v56  ;;  %v2063_v16 = vmul.f32 0.5, %v2059_v63  ;;  %s2744_s21 = scalar_lea.vmem %s2469_s20, 1024  ;;  %p2749_p7 = scmp.lt.s32.totalorder %s2469_s20, %s2469_s20 }
 0x6d4   :  { %p2745_p6 = scmp.ne.s32.totalorder %s2469_s20, %s2744_s21  ;;  %p2750_p8 = scmp.lt.s32.totalorder %s2744_s21, %s2744_s21 }
 0x6d5   :  { %2646 = vtanh.f32 %v2063_v16 }
 0x6d6   :  { %2648 = vtanh.f32 %v2061_v2  ;;  %p2751_p9 = por %p2750_p8, %p2749_p7 }
 0x6d7   :  { %2650 = vtanh.f32 %v2064_v11 }
 0x6d8   :  { %p2752_p10 = pnand %p2751_p9, %p2745_p6 }
 0x6e0   :  { %v2645_v4 = vpop.eup %2644 }
 0x6e1   :  { %v2068_v10 = vadd.f32 1.0, %v2645_v4 }
 0x6e2   :  { %v2647_v6 = vpop.eup %2646 }
 0x6e3   :  { %v2071_v23 = vmul.f32 0.5, %v2068_v10  ;;  %v2069_v25 = vadd.f32 1.0, %v2647_v6  ;;  %v2649_v27 = vpop.eup %2648 }
 0x6e4   :  { %v2651_v36 = vpop.eup %2650 }
 0x6e5   :  { %v2072_v29 = vmul.f32 0.5, %v2069_v25  ;;  %v2076_v31 = vmul.f32 %v2649_v27, %v2071_v23  ;;  %v2070_v59 = vadd.f32 1.0, %v2651_v36 }
 0x6e7   :  { %v2075_v33 = vmul.f32 %v2072_v29, %v3745_v54  ;;  %v2073_v20 = vmul.f32 0.5, %v2070_v59  ;;  %v2338_v54 = vld [vmem:[#allocation10 + $0x58] sm:$0xff] }
 0x6e9   :  { %v3768_v34 = vadd.f32 %v2076_v31, %v2075_v33 }
 0x6eb   :  { %2652 = vtanh.f32 %v3768_v34 }
 0x6f8   :  { %v2653_v22 = vpop.eup %2652 }
 0x6f9   :  { %v2079_v24 = vmul.f32 %v2653_v22, %v2073_v20 }
 0x6fb   :  { %2218 = vmatmul.mubr.f32.vlgmr.msra.gmra.mxu0 %v2079_v24  ;;  %2289 = vmatmul.mubr.f32.vlgmr.msra.gmra.mxu1 %v2079_v24 }
 0x6fc   :  { %2531 = vmatpush3.msra.mxu0 %v2342_v17  ;;  %2562 = vmatprep.mubr.f32.mxu0 %v4061_v28  ;;  %v4068_v17 = vld [vmem:[#allocation68_spill] sm:$0xff] }
 0x6fd   :  { %2532 = vmatprep.subr.mxu0 %v2341_v26 }
 0x6fe   :  { %2533 = vmatpush3.msra.mxu0 %v2341_v26 }
 0x6ff   :  { %2534 = vmatprep.subr.mxu0 %v2340_v30 }
 0x700   :  { %2535 = vmatpush3.msra.mxu0 %v2340_v30 }
 0x701   :  { %2536 = vmatprep.subr.mxu0 %v2339_v32 }
 0x702   :  { %2537 = vmatpush3.msra.mxu0 %v2339_v32 }
 0x703   :  { %2538 = vmatprep.subr.mxu0 %v2338_v54 }
 0x704   :  { %2539 = vmatpush3.msra.mxu0 %v2338_v54 }
 0x705   :  { %2540 = vmatprep.subr.mxu0 %v2337_v35 }
 0x706   :  { %2541 = vmatpush3.msra.mxu0 %v2337_v35 }
 0x707   :  { %2542 = vmatprep.subr.mxu0 %v2336_v37 }
 0x708   :  { %2543 = vmatpush3.msra.mxu0 %v2336_v37 }
 0x709   :  { %2544 = vmatprep.subr.mxu0 %v2335_v38 }
 0x70a   :  { %2545 = vmatpush3.msra.mxu0 %v2335_v38 }
 0x70b   :  { %2546 = vmatprep.subr.mxu0 %v2334_v40 }
 0x70c   :  { %2547 = vmatpush3.msra.mxu0 %v2334_v40 }
 0x70d   :  { %2548 = vmatprep.subr.mxu0 %v2333_v39 }
 0x70e   :  { %2549 = vmatpush3.msra.mxu0 %v2333_v39 }
 0x70f   :  { %2550 = vmatprep.subr.mxu0 %v2332_v41 }
 0x710   :  { %2551 = vmatpush3.msra.mxu0 %v2332_v41 }
 0x711   :  { %2552 = vmatprep.subr.mxu0 %v2331_v43 }
 0x712   :  { %2553 = vmatpush3.msra.mxu0 %v2331_v43 }
 0x713   :  { %2554 = vmatprep.subr.mxu0 %v2330_v46 }
 0x714   :  { %2555 = vmatpush3.msra.mxu0 %v2330_v46 }
 0x715   :  { %2556 = vmatprep.subr.mxu0 %v2329_v48 }
 0x716   :  { %2557 = vmatpush3.msra.mxu0 %v2329_v48 }
 0x717   :  { %2558 = vmatprep.subr.mxu0 %v2328_v53 }
 0x718   :  { %2559 = vmatpush3.msra.mxu0 %v2328_v53 }
 0x719   :  { %2560 = vmatprep.subr.mxu0 %v2327_v57 }
 0x71a   :  { %2561 = vmatpush3.msra.mxu0 %v2327_v57 }
 0x71b   :  { %2563 = vmatmul.mubr.f32.vlgmr.msra.gmra.mxu0 %v4062_v60 }
 0x71c   :  { %2565 = vmatprep.mubr.f32.mxu0 %v4063_v55 }
 0x71f   :  { %2566 = vmatmul.mubr.f32.gmra.mxu0 %v4064_v1 }
 0x720   :  { %2568 = vmatprep.mubr.f32.mxu0 %v3671_v15 }
 0x723   :  { %2569 = vmatmul.mubr.f32.gmra.mxu0 %v3748_v58 }
 0x724   :  { %2571 = vmatprep.mubr.f32.mxu0 %v2079_v24 }
 0x7bb   :  { %v2219_v5 = vpop.f32.mrf.mxu0  ;;  %v2290_v44 = vpop.f32.mrf.mxu1 }
 0x7bc   :  { %v2295_v18 = vadd.f32 %v2219_v5, %v4065_v14  ;;  %v2297_v15 = vadd.f32 %v2290_v44, %v4068_v17 }
 0x7bd   :  { %v2221_v7 = vpop.f32.mrf.mxu0  ;;  %v2292_v50 = vpop.f32.mrf.mxu1 }
 0x7be   :  { %v2299_v61 = vmul.f32 0.5, %v2295_v18  ;;  %v2296_v47 = vadd.f32 %v2221_v7, %v4066_v49  ;;  %v2298_v3 = vadd.f32 %v2292_v50, %v4067_v19  ;;  %v2301_v21 = vmul.f32 0.5, %v2297_v15 }
 0x7c0   :  { %2654 = vtanh.f32 %v2299_v61  ;;  %v2300_v13 = vmul.f32 0.5, %v2296_v47 }
 0x7c2   :  { %2656 = vtanh.f32 %v2300_v13 }
 0x7c3   :  { %2658 = vtanh.f32 %v2298_v3 }
 0x7c4   :  { %2660 = vtanh.f32 %v2301_v21 }
 0x7cd   :  { %v2655_v58 = vpop.eup %2654 }
 0x7ce   :  { %v2305_v52 = vadd.f32 1.0, %v2655_v58 }
 0x7cf   :  { %v2657_v12 = vpop.eup %2656 }
 0x7d0   :  { %v2308_v42 = vmul.f32 0.5, %v2305_v52  ;;  %v2306_v0 = vadd.f32 1.0, %v2657_v12  ;;  %v2659_v8 = vpop.eup %2658 }
 0x7d1   :  { %v2661_v45 = vpop.eup %2660 }
 0x7d2   :  { %v2309_v56 = vmul.f32 0.5, %v2306_v0  ;;  %v2313_v62 = vmul.f32 %v2659_v8, %v2308_v42  ;;  %v2307_v6 = vadd.f32 1.0, %v2661_v45 }
 0x7d4   :  { %v2312_v63 = vmul.f32 %v2309_v56, %v3768_v34  ;;  %v2310_v31 = vmul.f32 0.5, %v2307_v6 }
 0x7d6   :  { %v2314_v16 = vadd.f32 %v2313_v62, %v2312_v63 }
 0x7d8   :  { %2662 = vtanh.f32 %v2314_v16 }
 0x7db   :  { %v2564_v2 = vpop.f32.mrf.mxu0 }
 0x7dc   :  { %v2422_v9 = vadd.f32 %v2564_v2, %v2505_v51 }
 0x7dd   :  { %v2416_v11 = vpop.f32.mrf.mxu0 }
 0x7de   :  { %2456 = vst [vmem:[#allocation12 + $0x8] sm:$0xff] %v2422_v9  ;;  %v2417_v4 = vadd.f32 %v2505_v51, %v2416_v11 }
 0x7df   :  { %v2567_v10 = vpop.f32.mrf.mxu0 }
 0x7e0   :  { %2455 = vst [vmem:[#allocation12] sm:$0xff] %v2417_v4  ;;  %v2432_v23 = vadd.f32 %v2567_v10, %v2505_v51 }
 0x7e1   :  { %v2426_v25 = vpop.f32.mrf.mxu0 }
 0x7e2   :  { %2458 = vst [vmem:[#allocation12 + $0x18] sm:$0xff] %v2432_v23  ;;  %v2427_v27 = vadd.f32 %v2505_v51, %v2426_v25 }
 0x7e3   :  { %v2570_v29 = vpop.f32.mrf.mxu0 }
 0x7e4   :  { %2457 = vst [vmem:[#allocation12 + $0x10] sm:$0xff] %v2427_v27  ;;  %v2442_v33 = vadd.f32 %v2570_v29, %v2505_v51 }
 0x7e5   :  { %v2663_v34 = vpop.eup %2662  ;;  %v2436_v36 = vpop.f32.mrf.mxu0 }
 0x7e6   :  { %2460 = vst [vmem:[#allocation12 + $0x28] sm:$0xff] %v2442_v33  ;;  %v2437_v59 = vadd.f32 %v2505_v51, %v2436_v36  ;;  %v2316_v20 = vmul.f32 %v2663_v34, %v2310_v31 }
 0x7e8   :  { %2459 = vst [vmem:[#allocation12 + $0x20] sm:$0xff] %v2437_v59  ;;  %2572 = vmatmul.mubr.f32.gmra.mxu0 %v2316_v20 }
 0x8a8   :  { %v2573_v22 = vpop.f32.mrf.mxu0 }
 0x8a9   :  { %v2452_v24 = vadd.f32 %v2573_v22, %v2505_v51 }
 0x8aa   :  { %v2446_v26 = vpop.f32.mrf.mxu0 }
 0x8ab   :  { %2462 = vst [vmem:[#allocation12 + $0x38] sm:$0xff] %v2452_v24  ;;  %v2447_v28 = vadd.f32 %v2505_v51, %v2446_v26 }
 0x8ad   :  { %2461 = vst [vmem:[#allocation12 + $0x30] sm:$0xff] %v2447_v28 }
 0x8ae   :  { %2755 = shalt.err (!%p2752_p10)
}
 0x8af   :  { %2474 = dma.vmem_to_hbm [thread:$0]  %s2469_s20, 1024, %s3797_s6, [#allocation6], %s2776_s7, %s2776_s7, %s2777_s8  }
 0x8b0   :  { %2770 = dma.done.wait [#allocation6], 1024  }
 0x8b1   :  { %2771 = vsyncadd [#allocation6], 4294966272 }
 0x8b2   :  { %2478 = vsyncpa [#allocation5], 1 }
 0x8b3   :  { %2479 = vsyncpa [#allocation8], 1 }
 0x8b4   :  { %2480 = vsyncpa [#allocation11], 1 }
 0x8b5   :  { %2481 = vsyncpa [#allocation6], 1 }

</bundles_post_ra>
